<compile_context>
chip_gen: v7x
topology: tpu7x:2x2x1
jax: 0.10.0
libtpu: 0.0.40
codegen_flags: <defaults>
</compile_context>

<pallas_src>
import jax
import jax.numpy as jnp
import numpy as np
from jax.experimental import pallas as pl
from jax.experimental.pallas import tpu as pltpu


def make_encoder_kernel(num_layers, seq_len, batch_pad, hidden, din_pad):
    """Build the fused multi-layer LSTM kernel for static (L, T, Bp, H, Dp)."""
    H, Bp, T, L, Dp = hidden, batch_pad, seq_len, num_layers, din_pad

    def kernel(x_ref, hc0_ref, w_ref, b_ref, out_ref):
        # ---- weights: read once from the packed slab (8-row-aligned sections) ----
        w_ih0 = w_ref[0:Dp, :]                       # (Dp, 4H) layer-0 input proj
        w_hh0 = w_ref[Dp:Dp + H, :]                  # (H, 4H)  layer-0 recurrent
        w_cat = []                                   # fused [w_ih ; w_hh] per upper layer
        off = Dp + H
        for _ in range(1, L):
            w_cat.append(w_ref[off:off + 2 * H, :])  # (2H, 4H)
            off += 2 * H
        b = [b_ref[l:l + 1, :] for l in range(L)]    # (1, 4H), b_ih + b_hh folded

        # ---- hoisted, time-independent layer-0 input projection (+ bias) ----
        # One well-shaped (T*Bp, Dp) x (Dp, 4H) MXU matmul; nothing extra per step.
        gx0 = jnp.dot(x_ref[...], w_ih0, preferred_element_type=jnp.float32) + b[0]

        # ---- loop-carried per-layer state, held purely in vregs ----
        h = [hc0_ref[l * Bp:(l + 1) * Bp, :] for l in range(L)]            # (Bp, H)
        c = [hc0_ref[(L + l) * Bp:(L + l + 1) * Bp, :] for l in range(L)]  # (Bp, H)

        def cell(gates, c_prev):
            # Two full-vreg EUP passes; PyTorch gate order [i, f, g, o].
            sig = jax.nn.sigmoid(gates)
            tnh = jnp.tanh(gates)
            i_g = sig[:, 0 * H:1 * H]
            f_g = sig[:, 1 * H:2 * H]
            g_g = tnh[:, 2 * H:3 * H]
            o_g = sig[:, 3 * H:4 * H]
            c_new = f_g * c_prev + i_g * g_g
            h_new = o_g * jnp.tanh(c_new)
            return h_new, c_new

        # ---- layer-time wavefront over the recurrence ----
        # At wavefront w, layer l processes t = w - l.  Steps within a wavefront
        # are independent, so the scheduler interleaves their MXU pushes and EUP
        # passes.  Higher layers first so h[l-1] still holds its time-t value.
        for wf in range(T + L - 1):
            for l in range(L - 1, -1, -1):
                t = wf - l
                if not (0 <= t < T):
                    continue
                if l == 0:
                    # Sublane-aligned gx slice (Bp = 8 rows); accumulate-style so
                    # v7x MRB can fold the add into the matmul accumulate.
                    gates = gx0[t * Bp:(t + 1) * Bp, :] + jnp.dot(
                        h[0], w_hh0, preferred_element_type=jnp.float32)
                else:
                    # One fused MXU push: [h_below_t | h_own_(t-1)] @ [w_ih ; w_hh].
                    inp = jnp.concatenate([h[l - 1], h[l]], axis=1)        # (Bp, 2H)
                    gates = jnp.dot(inp, w_cat[l - 1],
                                    preferred_element_type=jnp.float32) + b[l]
                h[l], c[l] = cell(gates, c[l])

        # ---- single lane-dense output write: (Bp, 2*L*H) = [h0|c0|h1|c1|...] ----
        pieces = []
        for l in range(L):
            pieces += [h[l], c[l]]
        out_ref[...] = jnp.concatenate(pieces, axis=1).astype(out_ref.dtype)

    return kernel


def encoder_forward_pallas(x_tb, hc0, w_slab, b_slab, *, seq_len, batch_pad,
                           hidden, num_layers, din_pad):
    """Run the fused Encoder kernel on packed, padded inputs."""
    kernel = make_encoder_kernel(num_layers, seq_len, batch_pad, hidden, din_pad)
    vmem = pl.BlockSpec(memory_space=pltpu.MemorySpace.VMEM)
    out_shape = jax.ShapeDtypeStruct((batch_pad, 2 * num_layers * hidden),
                                     jnp.float32)
    return pl.pallas_call(
        kernel,
        out_shape=out_shape,
        in_specs=[vmem, vmem, vmem, vmem],
        out_specs=vmem,
    )(x_tb, hc0, w_slab, b_slab)


class EncoderPallas:
    """JAX/Pallas port of the PyTorch Encoder (stacked unidirectional LSTM)."""

    def __init__(self, input_size, hidden_size, num_layers, batch_size, key):
        self.input_size = input_size
        self.hidden_size = hidden_size
        self.num_layers = num_layers
        self.num_directions = 1
        self.batch_size = batch_size

        H = hidden_size
        # Deterministic synthetic parameters, PyTorch LSTM-style uniform(-k, k).
        k = 1.0 / np.sqrt(H)
        self.params = []                       # raw per-layer params (for reference)
        for layer in range(num_layers):
            d_in = input_size if layer == 0 else H
            key, k1, k2, k3, k4 = jax.random.split(key, 5)
            w_ih = jax.random.uniform(k1, (4 * H, d_in), jnp.float32, -k, k)
            w_hh = jax.random.uniform(k2, (4 * H, H), jnp.float32, -k, k)
            b_ih = jax.random.uniform(k3, (4 * H,), jnp.float32, -k, k)
            b_hh = jax.random.uniform(k4, (4 * H,), jnp.float32, -k, k)
            self.params.append({
                "w_ih_t": w_ih.T,                          # (D_in, 4H)
                "w_hh_t": w_hh.T,                          # (H, 4H)
                "b": (b_ih + b_hh).reshape(1, 4 * H),
            })

        # ---- packed kernel-side parameters (ONE weight slab + ONE bias slab) ----
        self.din_pad = max(8, ((input_size + 7) // 8) * 8)   # layer-0 D_in -> sublane group
        w0 = jnp.zeros((self.din_pad, 4 * H), jnp.float32)
        w0 = w0.at[:input_size, :].set(self.params[0]["w_ih_t"])
        rows = [w0, self.params[0]["w_hh_t"]]
        for l in range(1, num_layers):
            rows.append(jnp.concatenate(
                [self.params[l]["w_ih_t"], self.params[l]["w_hh_t"]], axis=0))
        self.w_slab = jnp.concatenate(rows, axis=0)           # (Dp + H + (L-1)*2H, 4H)
        self.b_slab = jnp.concatenate([p["b"] for p in self.params], axis=0)  # (L, 4H)

    def forward(self, input_seq, rng_key):
        """input_seq: (B, T, input_size) batch-first. Returns (h, c, (h_0, c_0))."""
        B, T, D = input_seq.shape
        H, L = self.hidden_size, self.num_layers
        Bp = max(8, ((B + 7) // 8) * 8)         # pad batch to full sublane groups
        Dp = self.din_pad

        kh, kc = jax.random.split(rng_key)
        # forward() draws fresh random initial states (matches torch.randn in ref).
        h_0 = jax.random.normal(kh, (L, B, H), jnp.float32)
        c_0 = jax.random.normal(kc, (L, B, H), jnp.float32)

        # Time-major, batch padded to Bp, layer-0 input dim padded to Dp, then
        # flattened so the hoisted layer-0 projection is one aligned matmul.
        x = jnp.transpose(input_seq, (1, 0, 2)).astype(jnp.float32)     # (T, B, D)
        x_p = jnp.zeros((T, Bp, Dp), jnp.float32).at[:, :B, :D].set(x)
        x_tb = x_p.reshape(T * Bp, Dp)

        # Merged, batch-padded h0/c0 slab: rows [l*Bp:...] = h0[l], then c0 blocks.
        h0p = jnp.zeros((L, Bp, H), jnp.float32).at[:, :B].set(h_0).reshape(L * Bp, H)
        c0p = jnp.zeros((L, Bp, H), jnp.float32).at[:, :B].set(c_0).reshape(L * Bp, H)
        hc0 = jnp.concatenate([h0p, c0p], axis=0)                        # (2*L*Bp, H)

        out = encoder_forward_pallas(
            x_tb, hc0, self.w_slab, self.b_slab,
            seq_len=T, batch_pad=Bp, hidden=H, num_layers=L, din_pad=Dp)

        # Unpack the single (Bp, 2*L*H) tile: lanes are [h_l | c_l] per layer.
        r = out[:B].reshape(B, L, 2, H)
        h = jnp.transpose(r[:, :, 0, :], (1, 0, 2))                      # (L, B, H)
        c = jnp.transpose(r[:, :, 1, :], (1, 0, 2))                      # (L, B, H)
        return h, c, (h_0, c_0)


def lstm_reference(x_btd, h0, c0, params, hidden_size):
    """Pure-JAX reference (lax.scan) for verification."""
    x = jnp.transpose(x_btd, (1, 0, 2)).astype(jnp.float32)
    H = hidden_size
    h_list, c_list = [], []
    for layer, p in enumerate(params):
        w_ih_t, w_hh_t, b = p["w_ih_t"], p["w_hh_t"], p["b"]

        def step(carry, x_t):
            h, c = carry
            gates = x_t @ w_ih_t + h @ w_hh_t + b
            i = jax.nn.sigmoid(gates[:, 0 * H:1 * H])
            f = jax.nn.sigmoid(gates[:, 1 * H:2 * H])
            g = jnp.tanh(gates[:, 2 * H:3 * H])
            o = jax.nn.sigmoid(gates[:, 3 * H:4 * H])
            c_new = f * c + i * g
            h_new = o * jnp.tanh(c_new)
            return (h_new, c_new), h_new

        (h_f, c_f), outs = jax.lax.scan(step, (h0[layer], c0[layer]), x)
        x = outs
        h_list.append(h_f)
        c_list.append(c_f)
    return jnp.stack(h_list, 0), jnp.stack(c_list, 0)


if __name__ == "__main__":
    # Small shapes consistent with the module: batch=2, seq=8, input=4, hidden=32.
    input_size, hidden_size, num_layers, batch_size = 4, 32, 2, 2
    seq_len = 8

    root = jax.random.PRNGKey(0)
    k_param, k_data, k_state = jax.random.split(root, 3)

    enc = EncoderPallas(input_size, hidden_size, num_layers, batch_size, k_param)
    input_seq = jax.random.normal(k_data, (batch_size, seq_len, input_size),
                                  jnp.float32)

    h, c, (h_0, c_0) = enc.forward(input_seq, k_state)
    h = jax.block_until_ready(h)
    c = jax.block_until_ready(c)

    # Verify against a pure-JAX reference using the same random initial states.
    # Tolerance is 1e-3: the fused [w_ih; w_hh] matmul changes the reduction
    # order vs. the reference's two separate dots (same MXU products, different
    # f32 accumulation order).
    h_ref, c_ref = lstm_reference(input_seq, h_0, c_0, enc.params, hidden_size)
    np.testing.assert_allclose(np.asarray(h), np.asarray(h_ref),
                               rtol=1e-3, atol=1e-3)
    np.testing.assert_allclose(np.asarray(c), np.asarray(c_ref),
                               rtol=1e-3, atol=1e-3)

    assert h.shape == (num_layers, batch_size, hidden_size)
    assert c.shape == (num_layers, batch_size, hidden_size)
    print("KERNEL_OK")
</pallas_src>

<mosaic_0001>
module attributes {stable_mosaic.version = 11 : i64} {
  func.func @kernel(%arg0: memref<64x8xf32, #tpu.memory_space<vmem>>, %arg1: memref<32x32xf32, #tpu.memory_space<vmem>>, %arg2: memref<104x128xf32, #tpu.memory_space<vmem>>, %arg3: memref<2x128xf32, #tpu.memory_space<vmem>>, %arg4: memref<8x128xf32, #tpu.memory_space<vmem>>) attributes {dimension_semantics = [], scalar_prefetch = 0 : i64, scratch_operands = 0 : i64, tpu.core_type = #tpu.core_type<tc>} {
    %c0 = arith.constant 0 : index
    %c0_0 = arith.constant 0 : index
    %0 = vector.load %arg2[%c0, %c0_0] : memref<104x128xf32, #tpu.memory_space<vmem>>, vector<8x128xf32>
    %c8 = arith.constant 8 : index
    %c0_1 = arith.constant 0 : index
    %1 = vector.load %arg2[%c8, %c0_1] : memref<104x128xf32, #tpu.memory_space<vmem>>, vector<32x128xf32>
    %c40 = arith.constant 40 : index
    %c0_2 = arith.constant 0 : index
    %2 = vector.load %arg2[%c40, %c0_2] : memref<104x128xf32, #tpu.memory_space<vmem>>, vector<64x128xf32>
    %c0_3 = arith.constant 0 : index
    %c0_4 = arith.constant 0 : index
    %3 = vector.load %arg3[%c0_3, %c0_4] : memref<2x128xf32, #tpu.memory_space<vmem>>, vector<1x128xf32>
    %c1 = arith.constant 1 : index
    %c0_5 = arith.constant 0 : index
    %4 = vector.load %arg3[%c1, %c0_5] : memref<2x128xf32, #tpu.memory_space<vmem>>, vector<1x128xf32>
    %c0_6 = arith.constant 0 : index
    %c0_7 = arith.constant 0 : index
    %5 = vector.load %arg0[%c0_6, %c0_7] : memref<64x8xf32, #tpu.memory_space<vmem>>, vector<64x8xf32>
    %cst = arith.constant dense<0.000000e+00> : vector<64x128xf32>
    %6 = tpu.matmul %5, %0, %cst {dimension_numbers = #tpu.dot_dimension_numbers<[1], [0], [0], [1], [0, 0, 1, 1], [], []>} : vector<64x8xf32>, vector<8x128xf32>, vector<64x128xf32> -> vector<64x128xf32>
    %7 = vector.broadcast %3 : vector<1x128xf32> to vector<64x128xf32>
    %8 = arith.addf %6, %7 : vector<64x128xf32>
    %c0_8 = arith.constant 0 : index
    %c0_9 = arith.constant 0 : index
    %9 = vector.load %arg1[%c0_8, %c0_9] : memref<32x32xf32, #tpu.memory_space<vmem>>, vector<8x32xf32>
    %c8_10 = arith.constant 8 : index
    %c0_11 = arith.constant 0 : index
    %10 = vector.load %arg1[%c8_10, %c0_11] : memref<32x32xf32, #tpu.memory_space<vmem>>, vector<8x32xf32>
    %c16 = arith.constant 16 : index
    %c0_12 = arith.constant 0 : index
    %11 = vector.load %arg1[%c16, %c0_12] : memref<32x32xf32, #tpu.memory_space<vmem>>, vector<8x32xf32>
    %c24 = arith.constant 24 : index
    %c0_13 = arith.constant 0 : index
    %12 = vector.load %arg1[%c24, %c0_13] : memref<32x32xf32, #tpu.memory_space<vmem>>, vector<8x32xf32>
    %13 = vector.extract_strided_slice %8 {offsets = [0, 0], sizes = [8, 128], strides = [1, 1]} : vector<64x128xf32> to vector<8x128xf32>
    %cst_14 = arith.constant dense<0.000000e+00> : vector<8x128xf32>
    %14 = tpu.matmul %9, %1, %cst_14 {dimension_numbers = #tpu.dot_dimension_numbers<[1], [0], [0], [1], [0, 0, 1, 1], [], []>} : vector<8x32xf32>, vector<32x128xf32>, vector<8x128xf32> -> vector<8x128xf32>
    %15 = arith.addf %13, %14 : vector<8x128xf32>
    %16 = arith.negf %15 : vector<8x128xf32>
    %17 = math.exp %16 : vector<8x128xf32>
    %cst_15 = arith.constant 1.000000e+00 : f32
    %18 = vector.broadcast %cst_15 : f32 to vector<8x128xf32>
    %19 = arith.addf %18, %17 : vector<8x128xf32>
    %20 = arith.divf %18, %19 : vector<8x128xf32>
    %21 = math.tanh %15 : vector<8x128xf32>
    %22 = vector.extract_strided_slice %20 {offsets = [0, 0], sizes = [8, 32], strides = [1, 1]} : vector<8x128xf32> to vector<8x32xf32>
    %23 = vector.extract_strided_slice %20 {offsets = [0, 32], sizes = [8, 32], strides = [1, 1]} : vector<8x128xf32> to vector<8x32xf32>
    %24 = vector.extract_strided_slice %21 {offsets = [0, 64], sizes = [8, 32], strides = [1, 1]} : vector<8x128xf32> to vector<8x32xf32>
    %25 = vector.extract_strided_slice %20 {offsets = [0, 96], sizes = [8, 32], strides = [1, 1]} : vector<8x128xf32> to vector<8x32xf32>
    %26 = arith.mulf %23, %11 : vector<8x32xf32>
    %27 = arith.mulf %22, %24 : vector<8x32xf32>
    %28 = arith.addf %26, %27 : vector<8x32xf32>
    %29 = math.tanh %28 : vector<8x32xf32>
    %30 = arith.mulf %25, %29 : vector<8x32xf32>
    %31 = tpu.concatenate %30, %10 in 1 : vector<8x32xf32>, vector<8x32xf32> -> vector<8x64xf32>
    %cst_16 = arith.constant dense<0.000000e+00> : vector<8x128xf32>
    %32 = tpu.matmul %31, %2, %cst_16 {dimension_numbers = #tpu.dot_dimension_numbers<[1], [0], [0], [1], [0, 0, 1, 1], [], []>} : vector<8x64xf32>, vector<64x128xf32>, vector<8x128xf32> -> vector<8x128xf32>
    %33 = vector.broadcast %4 : vector<1x128xf32> to vector<8x128xf32>
    %34 = arith.addf %32, %33 : vector<8x128xf32>
    %35 = arith.negf %34 : vector<8x128xf32>
    %36 = math.exp %35 : vector<8x128xf32>
    %cst_17 = arith.constant 1.000000e+00 : f32
    %37 = vector.broadcast %cst_17 : f32 to vector<8x128xf32>
    %38 = arith.addf %37, %36 : vector<8x128xf32>
    %39 = arith.divf %37, %38 : vector<8x128xf32>
    %40 = math.tanh %34 : vector<8x128xf32>
    %41 = vector.extract_strided_slice %39 {offsets = [0, 0], sizes = [8, 32], strides = [1, 1]} : vector<8x128xf32> to vector<8x32xf32>
    %42 = vector.extract_strided_slice %39 {offsets = [0, 32], sizes = [8, 32], strides = [1, 1]} : vector<8x128xf32> to vector<8x32xf32>
    %43 = vector.extract_strided_slice %40 {offsets = [0, 64], sizes = [8, 32], strides = [1, 1]} : vector<8x128xf32> to vector<8x32xf32>
    %44 = vector.extract_strided_slice %39 {offsets = [0, 96], sizes = [8, 32], strides = [1, 1]} : vector<8x128xf32> to vector<8x32xf32>
    %45 = arith.mulf %42, %12 : vector<8x32xf32>
    %46 = arith.mulf %41, %43 : vector<8x32xf32>
    %47 = arith.addf %45, %46 : vector<8x32xf32>
    %48 = math.tanh %47 : vector<8x32xf32>
    %49 = arith.mulf %44, %48 : vector<8x32xf32>
    %50 = vector.extract_strided_slice %8 {offsets = [8, 0], sizes = [8, 128], strides = [1, 1]} : vector<64x128xf32> to vector<8x128xf32>
    %cst_18 = arith.constant dense<0.000000e+00> : vector<8x128xf32>
    %51 = tpu.matmul %30, %1, %cst_18 {dimension_numbers = #tpu.dot_dimension_numbers<[1], [0], [0], [1], [0, 0, 1, 1], [], []>} : vector<8x32xf32>, vector<32x128xf32>, vector<8x128xf32> -> vector<8x128xf32>
    %52 = arith.addf %50, %51 : vector<8x128xf32>
    %53 = arith.negf %52 : vector<8x128xf32>
    %54 = math.exp %53 : vector<8x128xf32>
    %cst_19 = arith.constant 1.000000e+00 : f32
    %55 = vector.broadcast %cst_19 : f32 to vector<8x128xf32>
    %56 = arith.addf %55, %54 : vector<8x128xf32>
    %57 = arith.divf %55, %56 : vector<8x128xf32>
    %58 = math.tanh %52 : vector<8x128xf32>
    %59 = vector.extract_strided_slice %57 {offsets = [0, 0], sizes = [8, 32], strides = [1, 1]} : vector<8x128xf32> to vector<8x32xf32>
    %60 = vector.extract_strided_slice %57 {offsets = [0, 32], sizes = [8, 32], strides = [1, 1]} : vector<8x128xf32> to vector<8x32xf32>
    %61 = vector.extract_strided_slice %58 {offsets = [0, 64], sizes = [8, 32], strides = [1, 1]} : vector<8x128xf32> to vector<8x32xf32>
    %62 = vector.extract_strided_slice %57 {offsets = [0, 96], sizes = [8, 32], strides = [1, 1]} : vector<8x128xf32> to vector<8x32xf32>
    %63 = arith.mulf %60, %28 : vector<8x32xf32>
    %64 = arith.mulf %59, %61 : vector<8x32xf32>
    %65 = arith.addf %63, %64 : vector<8x32xf32>
    %66 = math.tanh %65 : vector<8x32xf32>
    %67 = arith.mulf %62, %66 : vector<8x32xf32>
    %68 = tpu.concatenate %67, %49 in 1 : vector<8x32xf32>, vector<8x32xf32> -> vector<8x64xf32>
    %cst_20 = arith.constant dense<0.000000e+00> : vector<8x128xf32>
    %69 = tpu.matmul %68, %2, %cst_20 {dimension_numbers = #tpu.dot_dimension_numbers<[1], [0], [0], [1], [0, 0, 1, 1], [], []>} : vector<8x64xf32>, vector<64x128xf32>, vector<8x128xf32> -> vector<8x128xf32>
    %70 = vector.broadcast %4 : vector<1x128xf32> to vector<8x128xf32>
    %71 = arith.addf %69, %70 : vector<8x128xf32>
    %72 = arith.negf %71 : vector<8x128xf32>
    %73 = math.exp %72 : vector<8x128xf32>
    %cst_21 = arith.constant 1.000000e+00 : f32
    %74 = vector.broadcast %cst_21 : f32 to vector<8x128xf32>
    %75 = arith.addf %74, %73 : vector<8x128xf32>
    %76 = arith.divf %74, %75 : vector<8x128xf32>
    %77 = math.tanh %71 : vector<8x128xf32>
    %78 = vector.extract_strided_slice %76 {offsets = [0, 0], sizes = [8, 32], strides = [1, 1]} : vector<8x128xf32> to vector<8x32xf32>
    %79 = vector.extract_strided_slice %76 {offsets = [0, 32], sizes = [8, 32], strides = [1, 1]} : vector<8x128xf32> to vector<8x32xf32>
    %80 = vector.extract_strided_slice %77 {offsets = [0, 64], sizes = [8, 32], strides = [1, 1]} : vector<8x128xf32> to vector<8x32xf32>
    %81 = vector.extract_strided_slice %76 {offsets = [0, 96], sizes = [8, 32], strides = [1, 1]} : vector<8x128xf32> to vector<8x32xf32>
    %82 = arith.mulf %79, %47 : vector<8x32xf32>
    %83 = arith.mulf %78, %80 : vector<8x32xf32>
    %84 = arith.addf %82, %83 : vector<8x32xf32>
    %85 = math.tanh %84 : vector<8x32xf32>
    %86 = arith.mulf %81, %85 : vector<8x32xf32>
    %87 = vector.extract_strided_slice %8 {offsets = [16, 0], sizes = [8, 128], strides = [1, 1]} : vector<64x128xf32> to vector<8x128xf32>
    %cst_22 = arith.constant dense<0.000000e+00> : vector<8x128xf32>
    %88 = tpu.matmul %67, %1, %cst_22 {dimension_numbers = #tpu.dot_dimension_numbers<[1], [0], [0], [1], [0, 0, 1, 1], [], []>} : vector<8x32xf32>, vector<32x128xf32>, vector<8x128xf32> -> vector<8x128xf32>
    %89 = arith.addf %87, %88 : vector<8x128xf32>
    %90 = arith.negf %89 : vector<8x128xf32>
    %91 = math.exp %90 : vector<8x128xf32>
    %cst_23 = arith.constant 1.000000e+00 : f32
    %92 = vector.broadcast %cst_23 : f32 to vector<8x128xf32>
    %93 = arith.addf %92, %91 : vector<8x128xf32>
    %94 = arith.divf %92, %93 : vector<8x128xf32>
    %95 = math.tanh %89 : vector<8x128xf32>
    %96 = vector.extract_strided_slice %94 {offsets = [0, 0], sizes = [8, 32], strides = [1, 1]} : vector<8x128xf32> to vector<8x32xf32>
    %97 = vector.extract_strided_slice %94 {offsets = [0, 32], sizes = [8, 32], strides = [1, 1]} : vector<8x128xf32> to vector<8x32xf32>
    %98 = vector.extract_strided_slice %95 {offsets = [0, 64], sizes = [8, 32], strides = [1, 1]} : vector<8x128xf32> to vector<8x32xf32>
    %99 = vector.extract_strided_slice %94 {offsets = [0, 96], sizes = [8, 32], strides = [1, 1]} : vector<8x128xf32> to vector<8x32xf32>
    %100 = arith.mulf %97, %65 : vector<8x32xf32>
    %101 = arith.mulf %96, %98 : vector<8x32xf32>
    %102 = arith.addf %100, %101 : vector<8x32xf32>
    %103 = math.tanh %102 : vector<8x32xf32>
    %104 = arith.mulf %99, %103 : vector<8x32xf32>
    %105 = tpu.concatenate %104, %86 in 1 : vector<8x32xf32>, vector<8x32xf32> -> vector<8x64xf32>
    %cst_24 = arith.constant dense<0.000000e+00> : vector<8x128xf32>
    %106 = tpu.matmul %105, %2, %cst_24 {dimension_numbers = #tpu.dot_dimension_numbers<[1], [0], [0], [1], [0, 0, 1, 1], [], []>} : vector<8x64xf32>, vector<64x128xf32>, vector<8x128xf32> -> vector<8x128xf32>
    %107 = vector.broadcast %4 : vector<1x128xf32> to vector<8x128xf32>
    %108 = arith.addf %106, %107 : vector<8x128xf32>
    %109 = arith.negf %108 : vector<8x128xf32>
    %110 = math.exp %109 : vector<8x128xf32>
    %cst_25 = arith.constant 1.000000e+00 : f32
    %111 = vector.broadcast %cst_25 : f32 to vector<8x128xf32>
    %112 = arith.addf %111, %110 : vector<8x128xf32>
    %113 = arith.divf %111, %112 : vector<8x128xf32>
    %114 = math.tanh %108 : vector<8x128xf32>
    %115 = vector.extract_strided_slice %113 {offsets = [0, 0], sizes = [8, 32], strides = [1, 1]} : vector<8x128xf32> to vector<8x32xf32>
    %116 = vector.extract_strided_slice %113 {offsets = [0, 32], sizes = [8, 32], strides = [1, 1]} : vector<8x128xf32> to vector<8x32xf32>
    %117 = vector.extract_strided_slice %114 {offsets = [0, 64], sizes = [8, 32], strides = [1, 1]} : vector<8x128xf32> to vector<8x32xf32>
    %118 = vector.extract_strided_slice %113 {offsets = [0, 96], sizes = [8, 32], strides = [1, 1]} : vector<8x128xf32> to vector<8x32xf32>
    %119 = arith.mulf %116, %84 : vector<8x32xf32>
    %120 = arith.mulf %115, %117 : vector<8x32xf32>
    %121 = arith.addf %119, %120 : vector<8x32xf32>
    %122 = math.tanh %121 : vector<8x32xf32>
    %123 = arith.mulf %118, %122 : vector<8x32xf32>
    %124 = vector.extract_strided_slice %8 {offsets = [24, 0], sizes = [8, 128], strides = [1, 1]} : vector<64x128xf32> to vector<8x128xf32>
    %cst_26 = arith.constant dense<0.000000e+00> : vector<8x128xf32>
    %125 = tpu.matmul %104, %1, %cst_26 {dimension_numbers = #tpu.dot_dimension_numbers<[1], [0], [0], [1], [0, 0, 1, 1], [], []>} : vector<8x32xf32>, vector<32x128xf32>, vector<8x128xf32> -> vector<8x128xf32>
    %126 = arith.addf %124, %125 : vector<8x128xf32>
    %127 = arith.negf %126 : vector<8x128xf32>
    %128 = math.exp %127 : vector<8x128xf32>
    %cst_27 = arith.constant 1.000000e+00 : f32
    %129 = vector.broadcast %cst_27 : f32 to vector<8x128xf32>
    %130 = arith.addf %129, %128 : vector<8x128xf32>
    %131 = arith.divf %129, %130 : vector<8x128xf32>
    %132 = math.tanh %126 : vector<8x128xf32>
    %133 = vector.extract_strided_slice %131 {offsets = [0, 0], sizes = [8, 32], strides = [1, 1]} : vector<8x128xf32> to vector<8x32xf32>
    %134 = vector.extract_strided_slice %131 {offsets = [0, 32], sizes = [8, 32], strides = [1, 1]} : vector<8x128xf32> to vector<8x32xf32>
    %135 = vector.extract_strided_slice %132 {offsets = [0, 64], sizes = [8, 32], strides = [1, 1]} : vector<8x128xf32> to vector<8x32xf32>
    %136 = vector.extract_strided_slice %131 {offsets = [0, 96], sizes = [8, 32], strides = [1, 1]} : vector<8x128xf32> to vector<8x32xf32>
    %137 = arith.mulf %134, %102 : vector<8x32xf32>
    %138 = arith.mulf %133, %135 : vector<8x32xf32>
    %139 = arith.addf %137, %138 : vector<8x32xf32>
    %140 = math.tanh %139 : vector<8x32xf32>
    %141 = arith.mulf %136, %140 : vector<8x32xf32>
    %142 = tpu.concatenate %141, %123 in 1 : vector<8x32xf32>, vector<8x32xf32> -> vector<8x64xf32>
    %cst_28 = arith.constant dense<0.000000e+00> : vector<8x128xf32>
    %143 = tpu.matmul %142, %2, %cst_28 {dimension_numbers = #tpu.dot_dimension_numbers<[1], [0], [0], [1], [0, 0, 1, 1], [], []>} : vector<8x64xf32>, vector<64x128xf32>, vector<8x128xf32> -> vector<8x128xf32>
    %144 = vector.broadcast %4 : vector<1x128xf32> to vector<8x128xf32>
    %145 = arith.addf %143, %144 : vector<8x128xf32>
    %146 = arith.negf %145 : vector<8x128xf32>
    %147 = math.exp %146 : vector<8x128xf32>
    %cst_29 = arith.constant 1.000000e+00 : f32
    %148 = vector.broadcast %cst_29 : f32 to vector<8x128xf32>
    %149 = arith.addf %148, %147 : vector<8x128xf32>
    %150 = arith.divf %148, %149 : vector<8x128xf32>
    %151 = math.tanh %145 : vector<8x128xf32>
    %152 = vector.extract_strided_slice %150 {offsets = [0, 0], sizes = [8, 32], strides = [1, 1]} : vector<8x128xf32> to vector<8x32xf32>
    %153 = vector.extract_strided_slice %150 {offsets = [0, 32], sizes = [8, 32], strides = [1, 1]} : vector<8x128xf32> to vector<8x32xf32>
    %154 = vector.extract_strided_slice %151 {offsets = [0, 64], sizes = [8, 32], strides = [1, 1]} : vector<8x128xf32> to vector<8x32xf32>
    %155 = vector.extract_strided_slice %150 {offsets = [0, 96], sizes = [8, 32], strides = [1, 1]} : vector<8x128xf32> to vector<8x32xf32>
    %156 = arith.mulf %153, %121 : vector<8x32xf32>
    %157 = arith.mulf %152, %154 : vector<8x32xf32>
    %158 = arith.addf %156, %157 : vector<8x32xf32>
    %159 = math.tanh %158 : vector<8x32xf32>
    %160 = arith.mulf %155, %159 : vector<8x32xf32>
    %161 = vector.extract_strided_slice %8 {offsets = [32, 0], sizes = [8, 128], strides = [1, 1]} : vector<64x128xf32> to vector<8x128xf32>
    %cst_30 = arith.constant dense<0.000000e+00> : vector<8x128xf32>
    %162 = tpu.matmul %141, %1, %cst_30 {dimension_numbers = #tpu.dot_dimension_numbers<[1], [0], [0], [1], [0, 0, 1, 1], [], []>} : vector<8x32xf32>, vector<32x128xf32>, vector<8x128xf32> -> vector<8x128xf32>
    %163 = arith.addf %161, %162 : vector<8x128xf32>
    %164 = arith.negf %163 : vector<8x128xf32>
    %165 = math.exp %164 : vector<8x128xf32>
    %cst_31 = arith.constant 1.000000e+00 : f32
    %166 = vector.broadcast %cst_31 : f32 to vector<8x128xf32>
    %167 = arith.addf %166, %165 : vector<8x128xf32>
    %168 = arith.divf %166, %167 : vector<8x128xf32>
    %169 = math.tanh %163 : vector<8x128xf32>
    %170 = vector.extract_strided_slice %168 {offsets = [0, 0], sizes = [8, 32], strides = [1, 1]} : vector<8x128xf32> to vector<8x32xf32>
    %171 = vector.extract_strided_slice %168 {offsets = [0, 32], sizes = [8, 32], strides = [1, 1]} : vector<8x128xf32> to vector<8x32xf32>
    %172 = vector.extract_strided_slice %169 {offsets = [0, 64], sizes = [8, 32], strides = [1, 1]} : vector<8x128xf32> to vector<8x32xf32>
    %173 = vector.extract_strided_slice %168 {offsets = [0, 96], sizes = [8, 32], strides = [1, 1]} : vector<8x128xf32> to vector<8x32xf32>
    %174 = arith.mulf %171, %139 : vector<8x32xf32>
    %175 = arith.mulf %170, %172 : vector<8x32xf32>
    %176 = arith.addf %174, %175 : vector<8x32xf32>
    %177 = math.tanh %176 : vector<8x32xf32>
    %178 = arith.mulf %173, %177 : vector<8x32xf32>
    %179 = tpu.concatenate %178, %160 in 1 : vector<8x32xf32>, vector<8x32xf32> -> vector<8x64xf32>
    %cst_32 = arith.constant dense<0.000000e+00> : vector<8x128xf32>
    %180 = tpu.matmul %179, %2, %cst_32 {dimension_numbers = #tpu.dot_dimension_numbers<[1], [0], [0], [1], [0, 0, 1, 1], [], []>} : vector<8x64xf32>, vector<64x128xf32>, vector<8x128xf32> -> vector<8x128xf32>
    %181 = vector.broadcast %4 : vector<1x128xf32> to vector<8x128xf32>
    %182 = arith.addf %180, %181 : vector<8x128xf32>
    %183 = arith.negf %182 : vector<8x128xf32>
    %184 = math.exp %183 : vector<8x128xf32>
    %cst_33 = arith.constant 1.000000e+00 : f32
    %185 = vector.broadcast %cst_33 : f32 to vector<8x128xf32>
    %186 = arith.addf %185, %184 : vector<8x128xf32>
    %187 = arith.divf %185, %186 : vector<8x128xf32>
    %188 = math.tanh %182 : vector<8x128xf32>
    %189 = vector.extract_strided_slice %187 {offsets = [0, 0], sizes = [8, 32], strides = [1, 1]} : vector<8x128xf32> to vector<8x32xf32>
    %190 = vector.extract_strided_slice %187 {offsets = [0, 32], sizes = [8, 32], strides = [1, 1]} : vector<8x128xf32> to vector<8x32xf32>
    %191 = vector.extract_strided_slice %188 {offsets = [0, 64], sizes = [8, 32], strides = [1, 1]} : vector<8x128xf32> to vector<8x32xf32>
    %192 = vector.extract_strided_slice %187 {offsets = [0, 96], sizes = [8, 32], strides = [1, 1]} : vector<8x128xf32> to vector<8x32xf32>
    %193 = arith.mulf %190, %158 : vector<8x32xf32>
    %194 = arith.mulf %189, %191 : vector<8x32xf32>
    %195 = arith.addf %193, %194 : vector<8x32xf32>
    %196 = math.tanh %195 : vector<8x32xf32>
    %197 = arith.mulf %192, %196 : vector<8x32xf32>
    %198 = vector.extract_strided_slice %8 {offsets = [40, 0], sizes = [8, 128], strides = [1, 1]} : vector<64x128xf32> to vector<8x128xf32>
    %cst_34 = arith.constant dense<0.000000e+00> : vector<8x128xf32>
    %199 = tpu.matmul %178, %1, %cst_34 {dimension_numbers = #tpu.dot_dimension_numbers<[1], [0], [0], [1], [0, 0, 1, 1], [], []>} : vector<8x32xf32>, vector<32x128xf32>, vector<8x128xf32> -> vector<8x128xf32>
    %200 = arith.addf %198, %199 : vector<8x128xf32>
    %201 = arith.negf %200 : vector<8x128xf32>
    %202 = math.exp %201 : vector<8x128xf32>
    %cst_35 = arith.constant 1.000000e+00 : f32
    %203 = vector.broadcast %cst_35 : f32 to vector<8x128xf32>
    %204 = arith.addf %203, %202 : vector<8x128xf32>
    %205 = arith.divf %203, %204 : vector<8x128xf32>
    %206 = math.tanh %200 : vector<8x128xf32>
    %207 = vector.extract_strided_slice %205 {offsets = [0, 0], sizes = [8, 32], strides = [1, 1]} : vector<8x128xf32> to vector<8x32xf32>
    %208 = vector.extract_strided_slice %205 {offsets = [0, 32], sizes = [8, 32], strides = [1, 1]} : vector<8x128xf32> to vector<8x32xf32>
    %209 = vector.extract_strided_slice %206 {offsets = [0, 64], sizes = [8, 32], strides = [1, 1]} : vector<8x128xf32> to vector<8x32xf32>
    %210 = vector.extract_strided_slice %205 {offsets = [0, 96], sizes = [8, 32], strides = [1, 1]} : vector<8x128xf32> to vector<8x32xf32>
    %211 = arith.mulf %208, %176 : vector<8x32xf32>
    %212 = arith.mulf %207, %209 : vector<8x32xf32>
    %213 = arith.addf %211, %212 : vector<8x32xf32>
    %214 = math.tanh %213 : vector<8x32xf32>
    %215 = arith.mulf %210, %214 : vector<8x32xf32>
    %216 = tpu.concatenate %215, %197 in 1 : vector<8x32xf32>, vector<8x32xf32> -> vector<8x64xf32>
    %cst_36 = arith.constant dense<0.000000e+00> : vector<8x128xf32>
    %217 = tpu.matmul %216, %2, %cst_36 {dimension_numbers = #tpu.dot_dimension_numbers<[1], [0], [0], [1], [0, 0, 1, 1], [], []>} : vector<8x64xf32>, vector<64x128xf32>, vector<8x128xf32> -> vector<8x128xf32>
    %218 = vector.broadcast %4 : vector<1x128xf32> to vector<8x128xf32>
    %219 = arith.addf %217, %218 : vector<8x128xf32>
    %220 = arith.negf %219 : vector<8x128xf32>
    %221 = math.exp %220 : vector<8x128xf32>
    %cst_37 = arith.constant 1.000000e+00 : f32
    %222 = vector.broadcast %cst_37 : f32 to vector<8x128xf32>
    %223 = arith.addf %222, %221 : vector<8x128xf32>
    %224 = arith.divf %222, %223 : vector<8x128xf32>
    %225 = math.tanh %219 : vector<8x128xf32>
    %226 = vector.extract_strided_slice %224 {offsets = [0, 0], sizes = [8, 32], strides = [1, 1]} : vector<8x128xf32> to vector<8x32xf32>
    %227 = vector.extract_strided_slice %224 {offsets = [0, 32], sizes = [8, 32], strides = [1, 1]} : vector<8x128xf32> to vector<8x32xf32>
    %228 = vector.extract_strided_slice %225 {offsets = [0, 64], sizes = [8, 32], strides = [1, 1]} : vector<8x128xf32> to vector<8x32xf32>
    %229 = vector.extract_strided_slice %224 {offsets = [0, 96], sizes = [8, 32], strides = [1, 1]} : vector<8x128xf32> to vector<8x32xf32>
    %230 = arith.mulf %227, %195 : vector<8x32xf32>
    %231 = arith.mulf %226, %228 : vector<8x32xf32>
    %232 = arith.addf %230, %231 : vector<8x32xf32>
    %233 = math.tanh %232 : vector<8x32xf32>
    %234 = arith.mulf %229, %233 : vector<8x32xf32>
    %235 = vector.extract_strided_slice %8 {offsets = [48, 0], sizes = [8, 128], strides = [1, 1]} : vector<64x128xf32> to vector<8x128xf32>
    %cst_38 = arith.constant dense<0.000000e+00> : vector<8x128xf32>
    %236 = tpu.matmul %215, %1, %cst_38 {dimension_numbers = #tpu.dot_dimension_numbers<[1], [0], [0], [1], [0, 0, 1, 1], [], []>} : vector<8x32xf32>, vector<32x128xf32>, vector<8x128xf32> -> vector<8x128xf32>
    %237 = arith.addf %235, %236 : vector<8x128xf32>
    %238 = arith.negf %237 : vector<8x128xf32>
    %239 = math.exp %238 : vector<8x128xf32>
    %cst_39 = arith.constant 1.000000e+00 : f32
    %240 = vector.broadcast %cst_39 : f32 to vector<8x128xf32>
    %241 = arith.addf %240, %239 : vector<8x128xf32>
    %242 = arith.divf %240, %241 : vector<8x128xf32>
    %243 = math.tanh %237 : vector<8x128xf32>
    %244 = vector.extract_strided_slice %242 {offsets = [0, 0], sizes = [8, 32], strides = [1, 1]} : vector<8x128xf32> to vector<8x32xf32>
    %245 = vector.extract_strided_slice %242 {offsets = [0, 32], sizes = [8, 32], strides = [1, 1]} : vector<8x128xf32> to vector<8x32xf32>
    %246 = vector.extract_strided_slice %243 {offsets = [0, 64], sizes = [8, 32], strides = [1, 1]} : vector<8x128xf32> to vector<8x32xf32>
    %247 = vector.extract_strided_slice %242 {offsets = [0, 96], sizes = [8, 32], strides = [1, 1]} : vector<8x128xf32> to vector<8x32xf32>
    %248 = arith.mulf %245, %213 : vector<8x32xf32>
    %249 = arith.mulf %244, %246 : vector<8x32xf32>
    %250 = arith.addf %248, %249 : vector<8x32xf32>
    %251 = math.tanh %250 : vector<8x32xf32>
    %252 = arith.mulf %247, %251 : vector<8x32xf32>
    %253 = tpu.concatenate %252, %234 in 1 : vector<8x32xf32>, vector<8x32xf32> -> vector<8x64xf32>
    %cst_40 = arith.constant dense<0.000000e+00> : vector<8x128xf32>
    %254 = tpu.matmul %253, %2, %cst_40 {dimension_numbers = #tpu.dot_dimension_numbers<[1], [0], [0], [1], [0, 0, 1, 1], [], []>} : vector<8x64xf32>, vector<64x128xf32>, vector<8x128xf32> -> vector<8x128xf32>
    %255 = vector.broadcast %4 : vector<1x128xf32> to vector<8x128xf32>
    %256 = arith.addf %254, %255 : vector<8x128xf32>
    %257 = arith.negf %256 : vector<8x128xf32>
    %258 = math.exp %257 : vector<8x128xf32>
    %cst_41 = arith.constant 1.000000e+00 : f32
    %259 = vector.broadcast %cst_41 : f32 to vector<8x128xf32>
    %260 = arith.addf %259, %258 : vector<8x128xf32>
    %261 = arith.divf %259, %260 : vector<8x128xf32>
    %262 = math.tanh %256 : vector<8x128xf32>
    %263 = vector.extract_strided_slice %261 {offsets = [0, 0], sizes = [8, 32], strides = [1, 1]} : vector<8x128xf32> to vector<8x32xf32>
    %264 = vector.extract_strided_slice %261 {offsets = [0, 32], sizes = [8, 32], strides = [1, 1]} : vector<8x128xf32> to vector<8x32xf32>
    %265 = vector.extract_strided_slice %262 {offsets = [0, 64], sizes = [8, 32], strides = [1, 1]} : vector<8x128xf32> to vector<8x32xf32>
    %266 = vector.extract_strided_slice %261 {offsets = [0, 96], sizes = [8, 32], strides = [1, 1]} : vector<8x128xf32> to vector<8x32xf32>
    %267 = arith.mulf %264, %232 : vector<8x32xf32>
    %268 = arith.mulf %263, %265 : vector<8x32xf32>
    %269 = arith.addf %267, %268 : vector<8x32xf32>
    %270 = math.tanh %269 : vector<8x32xf32>
    %271 = arith.mulf %266, %270 : vector<8x32xf32>
    %272 = vector.extract_strided_slice %8 {offsets = [56, 0], sizes = [8, 128], strides = [1, 1]} : vector<64x128xf32> to vector<8x128xf32>
    %cst_42 = arith.constant dense<0.000000e+00> : vector<8x128xf32>
    %273 = tpu.matmul %252, %1, %cst_42 {dimension_numbers = #tpu.dot_dimension_numbers<[1], [0], [0], [1], [0, 0, 1, 1], [], []>} : vector<8x32xf32>, vector<32x128xf32>, vector<8x128xf32> -> vector<8x128xf32>
    %274 = arith.addf %272, %273 : vector<8x128xf32>
    %275 = arith.negf %274 : vector<8x128xf32>
    %276 = math.exp %275 : vector<8x128xf32>
    %cst_43 = arith.constant 1.000000e+00 : f32
    %277 = vector.broadcast %cst_43 : f32 to vector<8x128xf32>
    %278 = arith.addf %277, %276 : vector<8x128xf32>
    %279 = arith.divf %277, %278 : vector<8x128xf32>
    %280 = math.tanh %274 : vector<8x128xf32>
    %281 = vector.extract_strided_slice %279 {offsets = [0, 0], sizes = [8, 32], strides = [1, 1]} : vector<8x128xf32> to vector<8x32xf32>
    %282 = vector.extract_strided_slice %279 {offsets = [0, 32], sizes = [8, 32], strides = [1, 1]} : vector<8x128xf32> to vector<8x32xf32>
    %283 = vector.extract_strided_slice %280 {offsets = [0, 64], sizes = [8, 32], strides = [1, 1]} : vector<8x128xf32> to vector<8x32xf32>
    %284 = vector.extract_strided_slice %279 {offsets = [0, 96], sizes = [8, 32], strides = [1, 1]} : vector<8x128xf32> to vector<8x32xf32>
    %285 = arith.mulf %282, %250 : vector<8x32xf32>
    %286 = arith.mulf %281, %283 : vector<8x32xf32>
    %287 = arith.addf %285, %286 : vector<8x32xf32>
    %288 = math.tanh %287 : vector<8x32xf32>
    %289 = arith.mulf %284, %288 : vector<8x32xf32>
    %290 = tpu.concatenate %289, %271 in 1 : vector<8x32xf32>, vector<8x32xf32> -> vector<8x64xf32>
    %cst_44 = arith.constant dense<0.000000e+00> : vector<8x128xf32>
    %291 = tpu.matmul %290, %2, %cst_44 {dimension_numbers = #tpu.dot_dimension_numbers<[1], [0], [0], [1], [0, 0, 1, 1], [], []>} : vector<8x64xf32>, vector<64x128xf32>, vector<8x128xf32> -> vector<8x128xf32>
    %292 = vector.broadcast %4 : vector<1x128xf32> to vector<8x128xf32>
    %293 = arith.addf %291, %292 : vector<8x128xf32>
    %294 = arith.negf %293 : vector<8x128xf32>
    %295 = math.exp %294 : vector<8x128xf32>
    %cst_45 = arith.constant 1.000000e+00 : f32
    %296 = vector.broadcast %cst_45 : f32 to vector<8x128xf32>
    %297 = arith.addf %296, %295 : vector<8x128xf32>
    %298 = arith.divf %296, %297 : vector<8x128xf32>
    %299 = math.tanh %293 : vector<8x128xf32>
    %300 = vector.extract_strided_slice %298 {offsets = [0, 0], sizes = [8, 32], strides = [1, 1]} : vector<8x128xf32> to vector<8x32xf32>
    %301 = vector.extract_strided_slice %298 {offsets = [0, 32], sizes = [8, 32], strides = [1, 1]} : vector<8x128xf32> to vector<8x32xf32>
    %302 = vector.extract_strided_slice %299 {offsets = [0, 64], sizes = [8, 32], strides = [1, 1]} : vector<8x128xf32> to vector<8x32xf32>
    %303 = vector.extract_strided_slice %298 {offsets = [0, 96], sizes = [8, 32], strides = [1, 1]} : vector<8x128xf32> to vector<8x32xf32>
    %304 = arith.mulf %301, %269 : vector<8x32xf32>
    %305 = arith.mulf %300, %302 : vector<8x32xf32>
    %306 = arith.addf %304, %305 : vector<8x32xf32>
    %307 = math.tanh %306 : vector<8x32xf32>
    %308 = arith.mulf %303, %307 : vector<8x32xf32>
    %309 = tpu.concatenate %289, %287, %308, %306 in 1 : vector<8x32xf32>, vector<8x32xf32>, vector<8x32xf32>, vector<8x32xf32> -> vector<8x128xf32>
    %c0_46 = arith.constant 0 : index
    %c0_47 = arith.constant 0 : index
    %310 = vector.load %arg4[%c0_46, %c0_47] : memref<8x128xf32, #tpu.memory_space<vmem>>, vector<8x128xf32>
    tpu.vector_store %arg4[%c0_46, %c0_47], %309 {strides = array<i32>} : memref<8x128xf32, #tpu.memory_space<vmem>>, vector<8x128xf32>,
    return
  }
}

</mosaic_0001>

<bundles_post_ra>
// kernel: tpu_custom_call.1
= control target key start
LH: loop header
LB: loop body
LE: loop exit
PB: predicated region body
PF: predicated region fallthrough
CT: control target
= control target key end

     0   :  { %9 = vsyncpa [#allocation3], 0  ;;  %s3030_s0 = inlined_call_operand.vmem [shape: f32[64,8], index: 0, kind: input, shape index: {}]   ;;  %s3031_s1 = inlined_call_operand.vmem [shape: f32[32,32], index: 1, kind: input, shape index: {}]   ;;  %s3032_s2 = inlined_call_operand.hbm [shape: f32[104,128], index: 2, kind: input, shape index: {}]   ;;  %s3033_s3 = inlined_call_operand.vmem [shape: f32[2,128], index: 3, kind: input, shape index: {}]   ;;  %s3034_s4 = inlined_call_operand.hbm [shape: f32[8,128], index: 4, kind: output, shape index: {}]  }
   0x1   :  { %10 = vsyncpa [#allocation4], 0  ;;  %s2607_s15 = smov [#allocation2]   ;;  %s2559_s19 = scalar_lea.hbm %s3032_s2, 1664 }
   0x2   :  { %s20_s16 = sshll.u32 %s2607_s15, 4  ;;  %p2560_p0 = scmp.ne.s32.totalorder %s3032_s2, %s2559_s19  ;;  %s21_s16 = int_to_ptr.vmem [resolvable:$true] %s20_s16 }
   0x3   :  { %p2563_p1 = scmp.lt.u32.totalorder %s2559_s19, %s3032_s2 }
   0x5   :  { %p2565_p2 = pnand %p2563_p1, %p2560_p0 }
   0x7   :  { %2568 = shalt.err (!%p2565_p2)
}
   0x8   :  { %s2569_s24 = scalar_lea.vmem %s21_s16, 1664  ;;  %p2574_p4 = scmp.lt.s32.totalorder %s21_s16, %s21_s16 }
   0x9   :  { %p2570_p3 = scmp.ne.s32.totalorder %s21_s16, %s2569_s24  ;;  %p2575_p5 = scmp.lt.s32.totalorder %s2569_s24, %s2569_s24 }
   0xb   :  { %p2576_p6 = por %p2575_p5, %p2574_p4 }
   0xd   :  { %p2577_p7 = pnand %p2576_p6, %p2570_p3 }
   0xf   :  { %2580 = shalt.err (!%p2577_p7)
}
  0x10   :  { %s2608_s25 = smov 128   ;;  %s2609_s26 = smov 8  }
  0x11   :  { %26 = dma.hbm_to_vmem [thread:$0]  %s3032_s2, 1664, %s21_s16, [#allocation3], %s2608_s25, %s2608_s25, %s2609_s26  }
  0x12   :  { %2603 = dma.done.wait [#allocation3], 1664  }
  0x13   :  { %2604 = vsyncadd [#allocation3], 4294965632  ;;  %v2610_v0 = vmov 0.0|0.0   ;;  %vm2611_vm0 = vmmov 0   ;;  %v2612_v1 = vmov 0.0   ;;  %vm59_vm1 = vcmask 64512  }
  0x14   :  { %2277 = vmatprep.subr.bf16.mxu1 %v2610_v0  ;;  %2045 = vmatprep.mubr.msk.f32.mxu1 %vm2611_vm0, %v2612_v1  ;;  %v33_v2 = vld [vmem:[#allocation2 + $0x8] sm:$0xff]  ;;  %v34_v3 = vld [vmem:[#allocation2 + $0x10] sm:$0xff]  ;;  %v32_v4 = vld [vmem:[#allocation2] sm:$0xff]  ;;  %vm193_vm2 = vcmask 261120   ;;  %s2613_s10 = smov 64   ;;  %s2614_s13 = smov 32  }
  0x15   :  { %v2657_v5 = vpack.c.bf16 %v34_v3, %v33_v2  ;;  %2023 = vmatprep.subr.mxu0 %v32_v4  ;;  %v47_v6 = vld [vmem:[%s3030_s0] sm:$0xff]  ;;  %v48_v7 = vld [vmem:[%s3030_s0 + $0x8] sm:$0xff]  ;;  %v35_v8 = vld [vmem:[#allocation2 + $0x18] sm:$0xff]  ;;  %vm309_vm3 = vcmask 523264   ;;  %vm1842_vm4 = vcmask 785408  }
  0x16   :  { %2024 = vmatpush3.msra.mxu0 %v32_v4  ;;  %2025 = vmatprep.mubr.msk.f32.mxu0 %vm59_vm1, %v47_v6  ;;  %v36_v9 = vld [vmem:[#allocation2 + $0x20] sm:$0xff]  ;;  %v191_v20 = vld [vmem:[%s3031_s1 + $0x10] sm:$0xff]  ;;  %v37_v31 = vld [vmem:[#allocation2 + $0x28] sm:$0xff] }
  0x17   :  { %2279 = vmatpush3.bf16.msra.mxu1 %v2657_v5  ;;  %2026 = vmatmul.mubr.msk.f32.vlgmr.msra.gmra.mrb[0].mxu0 %vm59_vm1, %v48_v7  ;;  %v2668_v10 = vpack.c.bf16 %v36_v9, %v35_v8  ;;  %v189_v11 = vld [vmem:[%s3031_s1] sm:$0xff]  ;;  %v38_v32 = vld [vmem:[#allocation2 + $0x30] sm:$0xff]  ;;  %v50_v35 = vld [vmem:[%s3030_s0 + $0x18] sm:$0xff] }
  0x18   :  { %2280 = vmatprep.subr.bf16.mxu1 %v2610_v0  ;;  %2283 = vmatprep.subr.bf16.mxu0 %v2610_v0  ;;  %v2685_v13 = vld [vmem:[%s3033_s3] ss:$0 sm:$0xff]  ;;  %v49_v33 = vld [vmem:[%s3030_s0 + $0x10] sm:$0xff]  ;;  %v2700_v34 = vpack.c.bf16 %v38_v32, %v37_v31  ;;  %v39_v36 = vld [vmem:[#allocation2 + $0x38] sm:$0xff] }
  0x19   :  { %2028 = vmatprep.mubr.msk.f32.mxu0 %vm59_vm1, %v49_v33  ;;  %v40_v37 = vld [vmem:[#allocation2 + $0x40] sm:$0xff]  ;;  %v52_v40 = vld [vmem:[%s3030_s0 + $0x28] sm:$0xff]  ;;  %v42_v42 = vld [vmem:[#allocation2 + $0x50] sm:$0xff] }
  0x1a   :  { %v51_v38 = vld [vmem:[%s3030_s0 + $0x20] sm:$0xff]  ;;  %2285 = vmatpush3.bf16.msra.mxu0 %v2700_v34  ;;  %v2711_v39 = vpack.c.bf16 %v40_v37, %v39_v36  ;;  %v41_v41 = vld [vmem:[#allocation2 + $0x48] sm:$0xff]  ;;  %v53_v43 = vld [vmem:[%s3030_s0 + $0x30] sm:$0xff] }
  0x1b   :  { %2282 = vmatpush3.bf16.msra.mxu1 %v2668_v10  ;;  %2029 = vmatmul.mubr.msk.f32.gmra.mrb[2].mxu0 %vm59_vm1, %v50_v35  ;;  %v2725_v44 = vpack.c.bf16 %v42_v42, %v41_v41  ;;  %v54_v45 = vld [vmem:[%s3030_s0 + $0x38] sm:$0xff]  ;;  %v44_v47 = vld [vmem:[#allocation2 + $0x60] sm:$0xff]  ;;  %v190_v50 = vld [vmem:[%s3031_s1 + $0x8] sm:$0xff] }
  0x1c   :  { %2301 = vmatprep.subr.bf16.mxu1 %v2610_v0  ;;  %2031 = vmatprep.mubr.msk.f32.mxu0 %vm59_vm1, %v51_v38  ;;  %v43_v46 = vld [vmem:[#allocation2 + $0x58] sm:$0xff]  ;;  %v2783_v62 = vld [vmem:[%s3033_s3 + $0x1] ss:$0 sm:$0xff]  ;;  %s2616_s3 = smov [#allocation5]  }
  0x1d   :  { %2286 = vmatprep.subr.bf16.mxu0 %v2610_v0  ;;  %v2737_v49 = vpack.c.bf16 %v44_v47, %v43_v46  ;;  %s1851_s2 = sshll.u32 %s2616_s3, 4  ;;  %s1852_s2 = int_to_ptr.vmem [resolvable:$true] %s1851_s2 }
  0x1e   :  { %2046 = vmatmul.mubr.msk.f32.vlgmr.msra.gmra.mrb[0].mxu1 %vm193_vm2, %v189_v11  ;;  %2288 = vmatpush3.bf16.msra.mxu0 %v2711_v39  ;;  %v192_v11 = vld [vmem:[%s3031_s1 + $0x18] sm:$0xff]  ;;  %s2615_s1 = smov 96   ;;  %s2581_s5 = scalar_lea.vmem %s1852_s2, 128 }
  0x1f   :  { %2094 = vmatprep.mubr.msk.f32.mxu1 %vm2611_vm0, %v2612_v1  ;;  %2303 = vmatpush3.bf16.msra.mxu1 %v2700_v34  ;;  %p2582_p8 = scmp.ne.s32.totalorder %s1852_s2, %s2581_s5  ;;  %p2586_p9 = scmp.lt.s32.totalorder %s1852_s2, %s1852_s2 }
  0x20   :  { %2304 = vmatprep.subr.bf16.mxu1 %v2610_v0  ;;  %2032 = vmatmul.mubr.msk.f32.gmra.mrb[4].mxu0 %vm59_vm1, %v52_v40  ;;  %p2587_p10 = scmp.lt.s32.totalorder %s2581_s5, %s2581_s5 }
  0x21   :  { %2034 = vmatprep.mubr.msk.f32.mxu0 %vm59_vm1, %v53_v43  ;;  %2289 = vmatprep.subr.bf16.mxu0 %v2610_v0 }
  0x22   :  { %2291 = vmatpush3.bf16.msra.mxu0 %v2725_v44  ;;  %p2588_p11 = por %p2587_p10, %p2586_p9 }
  0x23   :  { %2306 = vmatpush3.bf16.msra.mxu1 %v2711_v39  ;;  %2292 = vmatprep.subr.bf16.mxu0 %v2610_v0 }
  0x24   :  { %2307 = vmatprep.subr.bf16.mxu1 %v2610_v0  ;;  %2035 = vmatmul.mubr.msk.f32.gmra.mrb[6].mxu0 %vm59_vm1, %v54_v45  ;;  %p2589_p12 = pnand %p2588_p11, %p2582_p8 }
  0x25   :  { %2064 = vmatprep.mubr.msk.f32.mxu0 %vm2611_vm0, %v2612_v1 }
  0x26   :  { %2294 = vmatpush3.bf16.msra.mxu0 %v2737_v49 }
  0x27   :  { %2309 = vmatpush3.bf16.msra.mxu1 %v2725_v44  ;;  %2295 = vmatprep.subr.bf16.mxu0 %v2610_v0 }
  0x28   :  { %2310 = vmatprep.subr.bf16.mxu1 %v2610_v0 }
  0x2b   :  { %2312 = vmatpush3.bf16.msra.mxu1 %v2737_v49 }
  0x2c   :  { %2331 = vmatprep.subr.bf16.mxu1 %v2610_v0 }
  0xea   :  { %v2680_v12 = vpop.f32.mrb[0].mxu0 }
  0xeb   :  { %v150_v14 = vpop.f32.mrb[1].mxu0  ;;  %v156_v4 = vadd.f32 %v2680_v12, %v2685_v13 }
  0xec   :  { %v151_v15 = vadd.f32 %v2685_v13, %v150_v14 }
  0xee   :  { %v2753_v53 = vpop.f32.mrb[2].mxu0 }
  0xef   :  { %v2755_v54 = vpop.f32.mrb[3].mxu0 }
  0xf0   :  { %v161_v45 = vadd.f32 %v2685_v13, %v2755_v54 }
  0xf1   :  { %v263_v16 = vpop.f32.mrb[0].mxu1 }
  0xf2   :  { %v267_v17 = vadd.f32 %v263_v16, %v151_v15  ;;  %v2047_v18 = vpop.f32.mrb[1].mxu1 }
  0xf3   :  { %v2757_v55 = vpop.f32.mrb[4].mxu0 }
  0xf4   :  { %2431 = vtanh.f32 %v267_v17  ;;  %v1870_v21 = vmul.f32 -1.442695, %v267_v17  ;;  %v2759_v56 = vpop.f32.mrb[5].mxu0 }
  0xf6   :  { %2433 = vpow2.f32 %v1870_v21 }
  0xf7   :  { %v2761_v57 = vpop.f32.mrb[6].mxu0 }
  0xf8   :  { %v2763_v58 = vpop.f32.mrb[7].mxu0 }
  0xfe   :  { %v2432_v19 = vpop.eup %2431 }
  0xff   :  { %281 = vrot.lane.b32.xlu0 %v2432_v19, %s2613_s10 }
 0x100   :  { %v2434_v22 = vpop.eup %2433 }
 0x101   :  { %v271_v23 = vadd.f32 1.0, %v2434_v22 }
 0x103   :  { %276 = vrot.lane.b32.xlu0 %v191_v20, %s2614_s13  ;;  %2435 = vrcp.f32 %v271_v23 }
 0x10d   :  { %v2436_v24 = vpop.eup %2435 }
 0x171   :  { %v282_v25 = vpop.permute.xlu0 %281 }
 0x172   :  { %v284_v26 = vmul.f32 %v2436_v24, %v282_v25 }
 0x174   :  { %286 = vrot.lane.b32.xlu1 %v284_v26, %s2614_s13 }
 0x175   :  { %v277_v27 = vpop.permute.xlu0 %276 }
 0x176   :  { %v279_v28 = vmul.f32 %v2436_v24, %v277_v27 }
 0x1e6   :  { %v287_v29 = vpop.permute.xlu1 %286 }
 0x1e7   :  { %v2694_v30 = vadd.f32 %v287_v29, %v279_v28 }
 0x1e9   :  { %2437 = vtanh.f32 %v2694_v30 }
 0x1f3   :  { %v2438_v48 = vpop.eup %2437 }
 0x1f4   :  { %292 = vrot.lane.b32.xlu1 %v2438_v48, %s2613_s10 }
 0x1f8   :  { %301 = vrot.lane.b32.xlu1 %v190_v50, %s2614_s13 }
 0x266   :  { %v293_v51 = vpop.permute.xlu1 %292 }
 0x267   :  { %v295_v52 = vmul.f32 %v2436_v24, %v293_v51 }
 0x269   :  { %297 = vrot.lane.b32.xlu0 %v295_v52, %s2614_s13 }
 0x26a   :  { %v302_v59 = vpop.permute.xlu1 %301 }
 0x2db   :  { %v298_v60 = vpop.permute.xlu0 %297 }
 0x2dc   :  { %v304_v61 = vsel %vm193_vm2, %v298_v60, %v302_v59 }
 0x2dd   :  { %2065 = vmatmul.mubr.msk.f32.vlgmr.msra.gmra.mrb[8].mxu0 %vm309_vm3, %v304_v61 }
 0x2de   :  { %2297 = vmatpush3.bf16.msra.mxu0 %v2657_v5  ;;  %2075 = vmatprep.mubr.msk.f32.mxu0 %vm2611_vm0, %v2612_v1 }
 0x2df   :  { %2298 = vmatprep.subr.bf16.mxu0 %v2610_v0 }
 0x2e2   :  { %2300 = vmatpush3.bf16.msra.mxu0 %v2668_v10 }
 0x2e3   :  { %2313 = vmatprep.subr.bf16.mxu0 %v2610_v0 }
 0x2e5   :  { %2076 = vmatmul.mubr.msk.f32.vlgmr.msra.gmra.mrb[10].mxu0 %vm193_vm2, %v298_v60 }
 0x2e6   :  { %2315 = vmatpush3.bf16.msra.mxu0 %v2657_v5  ;;  %2105 = vmatprep.mubr.msk.f32.mxu0 %vm2611_vm0, %v2612_v1 }
 0x2e7   :  { %2316 = vmatprep.subr.bf16.mxu0 %v2610_v0 }
 0x2ea   :  { %2318 = vmatpush3.bf16.msra.mxu0 %v2668_v10 }
 0x2eb   :  { %2319 = vmatprep.subr.bf16.mxu0 %v2610_v0 }
 0x3b0   :  { %v379_v63 = vpop.f32.mrb[8].mxu0 }
 0x3b1   :  { %v380_v2 = vadd.f32 %v2783_v62, %v379_v63  ;;  %v2066_v3 = vpop.f32.mrb[9].mxu0 }
 0x3b3   :  { %2439 = vtanh.f32 %v380_v2  ;;  %v1873_v15 = vmul.f32 -1.442695, %v380_v2 }
 0x3b8   :  { %v479_v6 = vpop.f32.mrb[10].mxu0 }
 0x3b9   :  { %v483_v7 = vadd.f32 %v479_v6, %v156_v4  ;;  %v2077_v8 = vpop.f32.mrb[11].mxu0 }
 0x3bb   :  { %2441 = vtanh.f32 %v483_v7  ;;  %v1875_v16 = vmul.f32 -1.442695, %v483_v7 }
 0x3bc   :  { %2443 = vpow2.f32 %v1873_v15 }
 0x3bd   :  { %v2440_v9 = vpop.eup %2439  ;;  %2445 = vpow2.f32 %v1875_v16 }
 0x3be   :  { %396 = vrot.lane.b32.xlu0 %v2440_v9, %s2613_s10 }
 0x3c2   :  { %391 = vrot.lane.b32.xlu0 %v192_v11, %s2614_s13 }
 0x3c5   :  { %v2442_v14 = vpop.eup %2441 }
 0x3c6   :  { %493 = vrot.lane.b32.xlu1 %v2442_v14, %s2613_s10  ;;  %v2444_v12 = vpop.eup %2443 }
 0x3c7   :  { %v386_v17 = vadd.f32 1.0, %v2444_v12  ;;  %v2446_v18 = vpop.eup %2445 }
 0x3c8   :  { %v487_v19 = vadd.f32 1.0, %v2446_v18 }
 0x3c9   :  { %2447 = vrcp.f32 %v386_v17 }
 0x3ca   :  { %2449 = vrcp.f32 %v487_v19 }
 0x3d3   :  { %v2448_v20 = vpop.eup %2447 }
 0x3d4   :  { %v2450_v23 = vpop.eup %2449 }
 0x3d5   :  { %v491_v31 = vmul.f32 %v2450_v23, %v2694_v30 }
 0x430   :  { %v397_v21 = vpop.permute.xlu0 %396 }
 0x431   :  { %v399_v22 = vmul.f32 %v2448_v20, %v397_v21 }
 0x433   :  { %401 = vrot.lane.b32.xlu1 %v399_v22, %s2614_s13 }
 0x434   :  { %v392_v26 = vpop.permute.xlu0 %391 }
 0x435   :  { %v394_v27 = vmul.f32 %v2448_v20, %v392_v26 }
 0x438   :  { %v494_v24 = vpop.permute.xlu1 %493 }
 0x439   :  { %v496_v25 = vmul.f32 %v2450_v23, %v494_v24 }
 0x43b   :  { %498 = vrot.lane.b32.xlu0 %v496_v25, %s2614_s13 }
 0x4a5   :  { %v402_v28 = vpop.permute.xlu1 %401 }
 0x4a6   :  { %v2796_v29 = vadd.f32 %v402_v28, %v394_v27 }
 0x4a8   :  { %2451 = vtanh.f32 %v2796_v29 }
 0x4ad   :  { %v499_v32 = vpop.permute.xlu0 %498 }
 0x4ae   :  { %v501_v33 = vadd.f32 %v499_v32, %v491_v31 }
 0x4b0   :  { %2453 = vtanh.f32 %v501_v33 }
 0x4b2   :  { %v2452_v35 = vpop.eup %2451 }
 0x4b3   :  { %407 = vrot.lane.b32.xlu1 %v2452_v35, %s2613_s10 }
 0x4ba   :  { %v2454_v36 = vpop.eup %2453 }
 0x4bb   :  { %504 = vrot.lane.b32.xlu0 %v2454_v36, %s2613_s10 }
 0x525   :  { %v408_v37 = vpop.permute.xlu1 %407 }
 0x526   :  { %v410_v38 = vmul.f32 %v2448_v20, %v408_v37 }
 0x528   :  { %513 = vrot.lane.b32.xlu0 %v410_v38, %s2613_s10 }
 0x52d   :  { %v505_v40 = vpop.permute.xlu0 %504 }
 0x52e   :  { %v507_v41 = vmul.f32 %v2450_v23, %v505_v40 }
 0x530   :  { %509 = vrot.lane.b32.xlu1 %v507_v41, %s2614_s13 }
 0x59a   :  { %v514_v42 = vpop.permute.xlu0 %513 }
 0x5a2   :  { %v510_v43 = vpop.permute.xlu1 %509 }
 0x5a3   :  { %v516_v30 = vsel %vm193_vm2, %v510_v43, %v514_v42  ;;  %2106 = vmatmul.mubr.msk.f32.vlgmr.msra.gmra.mrb[12].mxu0 %vm193_vm2, %v510_v43 }
 0x5a4   :  { %2095 = vmatmul.mubr.msk.f32.vlgmr.msra.gmra.mrb[2].mxu1 %vm309_vm3, %v516_v30  ;;  %2321 = vmatpush3.bf16.msra.mxu0 %v2700_v34 }
 0x5a5   :  { %2322 = vmatprep.subr.bf16.mxu0 %v2610_v0  ;;  %2333 = vmatpush3.bf16.msra.mxu1 %v2657_v5 }
 0x5a6   :  { %2334 = vmatprep.subr.bf16.mxu1 %v2610_v0  ;;  %2135 = vmatprep.mubr.msk.f32.mxu1 %vm2611_vm0, %v2612_v1 }
 0x5a7   :  { %2124 = vmatprep.mubr.msk.f32.mxu0 %vm2611_vm0, %v2612_v1 }
 0x5a8   :  { %2324 = vmatpush3.bf16.msra.mxu0 %v2711_v39 }
 0x5a9   :  { %2325 = vmatprep.subr.bf16.mxu0 %v2610_v0  ;;  %2336 = vmatpush3.bf16.msra.mxu1 %v2668_v10 }
 0x5aa   :  { %2337 = vmatprep.subr.bf16.mxu1 %v2610_v0 }
 0x5ac   :  { %2327 = vmatpush3.bf16.msra.mxu0 %v2725_v44 }
 0x5ad   :  { %2328 = vmatprep.subr.bf16.mxu0 %v2610_v0 }
 0x5b0   :  { %2330 = vmatpush3.bf16.msra.mxu0 %v2737_v49 }
 0x5b1   :  { %2349 = vmatprep.subr.bf16.mxu0 %v2610_v0 }
 0x676   :  { %v682_v46 = vpop.f32.mrb[12].mxu0 }
 0x677   :  { %v686_v47 = vadd.f32 %v682_v46, %v161_v45  ;;  %v586_v48 = vpop.f32.mrb[2].mxu1  ;;  %v2107_v50 = vpop.f32.mrb[13].mxu0 }
 0x678   :  { %v587_v51 = vadd.f32 %v2783_v62, %v586_v48  ;;  %v2096_v52 = vpop.f32.mrb[3].mxu1 }
 0x679   :  { %2455 = vtanh.f32 %v686_v47  ;;  %v1879_v61 = vmul.f32 -1.442695, %v686_v47 }
 0x67a   :  { %2457 = vtanh.f32 %v587_v51  ;;  %v1877_v63 = vmul.f32 -1.442695, %v587_v51 }
 0x67b   :  { %2459 = vpow2.f32 %v1879_v61 }
 0x67c   :  { %2461 = vpow2.f32 %v1877_v63 }
 0x683   :  { %v2456_v59 = vpop.eup %2455 }
 0x684   :  { %v2458_v60 = vpop.eup %2457  ;;  %696 = vrot.lane.b32.xlu0 %v2456_v59, %s2613_s10 }
 0x685   :  { %599 = vrot.lane.b32.xlu1 %v2458_v60, %s2613_s10  ;;  %v2460_v54 = vpop.eup %2459 }
 0x686   :  { %v2462_v2 = vpop.eup %2461  ;;  %v690_v3 = vadd.f32 1.0, %v2460_v54 }
 0x687   :  { %v593_v4 = vadd.f32 1.0, %v2462_v2 }
 0x688   :  { %2463 = vrcp.f32 %v690_v3 }
 0x689   :  { %2465 = vrcp.f32 %v593_v4 }
 0x692   :  { %v2464_v6 = vpop.eup %2463 }
 0x693   :  { %v2466_v8 = vpop.eup %2465  ;;  %v694_v15 = vmul.f32 %v2464_v6, %v501_v33 }
 0x694   :  { %v597_v12 = vmul.f32 %v2466_v8, %v2796_v29  ;;  %v166_v29 = vadd.f32 %v2753_v53, %v2685_v13 }
 0x6f6   :  { %v697_v7 = vpop.permute.xlu0 %696 }
 0x6f7   :  { %v699_v9 = vmul.f32 %v2464_v6, %v697_v7  ;;  %v600_v11 = vpop.permute.xlu1 %599 }
 0x6f8   :  { %v602_v14 = vmul.f32 %v2466_v8, %v600_v11 }
 0x6f9   :  { %701 = vrot.lane.b32.xlu0 %v699_v9, %s2614_s13 }
 0x6fa   :  { %604 = vrot.lane.b32.xlu1 %v602_v14, %s2614_s13 }
 0x76b   :  { %v702_v16 = vpop.permute.xlu0 %701 }
 0x76c   :  { %v2831_v17 = vadd.f32 %v702_v16, %v694_v15  ;;  %v605_v18 = vpop.permute.xlu1 %604  ;;  %v171_v16 = vadd.f32 %v2685_v13, %v2759_v56 }
 0x76d   :  { %v2833_v19 = vadd.f32 %v605_v18, %v597_v12 }
 0x76e   :  { %2467 = vtanh.f32 %v2831_v17 }
 0x76f   :  { %2469 = vtanh.f32 %v2833_v19 }
 0x778   :  { %v2468_v20 = vpop.eup %2467 }
 0x779   :  { %v2470_v21 = vpop.eup %2469  ;;  %707 = vrot.lane.b32.xlu0 %v2468_v20, %s2613_s10 }
 0x77a   :  { %610 = vrot.lane.b32.xlu1 %v2470_v21, %s2613_s10 }
 0x7eb   :  { %v708_v22 = vpop.permute.xlu0 %707 }
 0x7ec   :  { %v710_v23 = vmul.f32 %v2464_v6, %v708_v22  ;;  %v611_v24 = vpop.permute.xlu1 %610 }
 0x7ed   :  { %v613_v25 = vmul.f32 %v2466_v8, %v611_v24 }
 0x7ee   :  { %712 = vrot.lane.b32.xlu1 %v710_v23, %s2614_s13 }
 0x7ef   :  { %716 = vrot.lane.b32.xlu0 %v613_v25, %s2613_s10 }
 0x860   :  { %v713_v26 = vpop.permute.xlu1 %712 }
 0x861   :  { %2136 = vmatmul.mubr.msk.f32.vlgmr.msra.gmra.mrb[4].mxu1 %vm193_vm2, %v713_v26  ;;  %v717_v27 = vpop.permute.xlu0 %716 }
 0x862   :  { %v719_v28 = vsel %vm193_vm2, %v713_v26, %v717_v27  ;;  %2339 = vmatpush3.bf16.msra.mxu1 %v2700_v34  ;;  %2154 = vmatprep.mubr.msk.f32.mxu1 %vm2611_vm0, %v2612_v1 }
 0x863   :  { %2125 = vmatmul.mubr.msk.f32.vlgmr.msra.gmra.mrb[14].mxu0 %vm309_vm3, %v719_v28  ;;  %2340 = vmatprep.subr.bf16.mxu1 %v2610_v0 }
 0x864   :  { %2351 = vmatpush3.bf16.msra.mxu0 %v2657_v5  ;;  %2165 = vmatprep.mubr.msk.f32.mxu0 %vm2611_vm0, %v2612_v1 }
 0x865   :  { %2352 = vmatprep.subr.bf16.mxu0 %v2610_v0 }
 0x866   :  { %2342 = vmatpush3.bf16.msra.mxu1 %v2711_v39 }
 0x867   :  { %2343 = vmatprep.subr.bf16.mxu1 %v2610_v0 }
 0x868   :  { %2354 = vmatpush3.bf16.msra.mxu0 %v2668_v10 }
 0x869   :  { %2355 = vmatprep.subr.bf16.mxu0 %v2610_v0 }
 0x86a   :  { %2345 = vmatpush3.bf16.msra.mxu1 %v2725_v44 }
 0x86b   :  { %2346 = vmatprep.subr.bf16.mxu1 %v2610_v0 }
 0x86e   :  { %2348 = vmatpush3.bf16.msra.mxu1 %v2737_v49 }
 0x86f   :  { %2367 = vmatprep.subr.bf16.mxu1 %v2610_v0 }
 0x934   :  { %v885_v31 = vpop.f32.mrb[4].mxu1 }
 0x935   :  { %v889_v32 = vadd.f32 %v885_v31, %v166_v29  ;;  %v2137_v33 = vpop.f32.mrb[5].mxu1 }
 0x936   :  { %v789_v35 = vpop.f32.mrb[14].mxu0 }
 0x937   :  { %2471 = vtanh.f32 %v889_v32  ;;  %v790_v36 = vadd.f32 %v2783_v62, %v789_v35  ;;  %v2126_v37 = vpop.f32.mrb[15].mxu0  ;;  %v1883_v41 = vmul.f32 -1.442695, %v889_v32 }
 0x939   :  { %2473 = vtanh.f32 %v790_v36  ;;  %v1881_v42 = vmul.f32 -1.442695, %v790_v36 }
 0x93a   :  { %2475 = vpow2.f32 %v1883_v41 }
 0x93b   :  { %2477 = vpow2.f32 %v1881_v42 }
 0x941   :  { %v2472_v38 = vpop.eup %2471 }
 0x942   :  { %899 = vrot.lane.b32.xlu0 %v2472_v38, %s2613_s10 }
 0x943   :  { %v2474_v40 = vpop.eup %2473 }
 0x944   :  { %802 = vrot.lane.b32.xlu1 %v2474_v40, %s2613_s10  ;;  %v2476_v53 = vpop.eup %2475 }
 0x945   :  { %v2478_v43 = vpop.eup %2477  ;;  %v893_v30 = vadd.f32 1.0, %v2476_v53 }
 0x946   :  { %v796_v45 = vadd.f32 1.0, %v2478_v43 }
 0x947   :  { %2479 = vrcp.f32 %v893_v30 }
 0x948   :  { %2481 = vrcp.f32 %v796_v45 }
 0x951   :  { %v2480_v46 = vpop.eup %2479 }
 0x952   :  { %v2482_v50 = vpop.eup %2481  ;;  %v897_v59 = vmul.f32 %v2480_v46, %v2831_v17 }
 0x953   :  { %v800_v63 = vmul.f32 %v2482_v50, %v2833_v19 }
 0x9b4   :  { %v900_v47 = vpop.permute.xlu0 %899 }
 0x9b5   :  { %v902_v48 = vmul.f32 %v2480_v46, %v900_v47 }
 0x9b6   :  { %v803_v51 = vpop.permute.xlu1 %802 }
 0x9b7   :  { %904 = vrot.lane.b32.xlu0 %v902_v48, %s2614_s13  ;;  %v805_v52 = vmul.f32 %v2482_v50, %v803_v51 }
 0x9b9   :  { %807 = vrot.lane.b32.xlu1 %v805_v52, %s2614_s13 }
 0xa29   :  { %v905_v60 = vpop.permute.xlu0 %904 }
 0xa2a   :  { %v2868_v61 = vadd.f32 %v905_v60, %v897_v59  ;;  %v176_v59 = vadd.f32 %v2757_v55, %v2685_v13 }
 0xa2b   :  { %v808_v54 = vpop.permute.xlu1 %807 }
 0xa2c   :  { %2483 = vtanh.f32 %v2868_v61  ;;  %v2872_v2 = vadd.f32 %v808_v54, %v800_v63 }
 0xa2e   :  { %2485 = vtanh.f32 %v2872_v2 }
 0xa36   :  { %v2484_v3 = vpop.eup %2483 }
 0xa37   :  { %910 = vrot.lane.b32.xlu0 %v2484_v3, %s2613_s10 }
 0xa38   :  { %v2486_v4 = vpop.eup %2485 }
 0xa39   :  { %813 = vrot.lane.b32.xlu1 %v2486_v4, %s2613_s10 }
 0xaa9   :  { %v911_v6 = vpop.permute.xlu0 %910 }
 0xaaa   :  { %v913_v7 = vmul.f32 %v2480_v46, %v911_v6 }
 0xaab   :  { %v814_v8 = vpop.permute.xlu1 %813 }
 0xaac   :  { %915 = vrot.lane.b32.xlu1 %v913_v7, %s2614_s13  ;;  %v816_v9 = vmul.f32 %v2482_v50, %v814_v8 }
 0xaae   :  { %919 = vrot.lane.b32.xlu0 %v816_v9, %s2613_s10 }
 0xb1e   :  { %v916_v11 = vpop.permute.xlu1 %915 }
 0xb1f   :  { %2166 = vmatmul.mubr.msk.f32.vlgmr.msra.gmra.mrb[16].mxu0 %vm193_vm2, %v916_v11 }
 0xb20   :  { %2357 = vmatpush3.bf16.msra.mxu0 %v2700_v34  ;;  %2184 = vmatprep.mubr.msk.f32.mxu0 %vm2611_vm0, %v2612_v1  ;;  %v920_v14 = vpop.permute.xlu0 %919 }
 0xb21   :  { %2358 = vmatprep.subr.bf16.mxu0 %v2610_v0  ;;  %v922_v15 = vsel %vm193_vm2, %v916_v11, %v920_v14 }
 0xb22   :  { %2155 = vmatmul.mubr.msk.f32.vlgmr.msra.gmra.mrb[6].mxu1 %vm309_vm3, %v922_v15 }
 0xb23   :  { %2369 = vmatpush3.bf16.msra.mxu1 %v2657_v5  ;;  %2195 = vmatprep.mubr.msk.f32.mxu1 %vm2611_vm0, %v2612_v1 }
 0xb24   :  { %2360 = vmatpush3.bf16.msra.mxu0 %v2711_v39  ;;  %2370 = vmatprep.subr.bf16.mxu1 %v2610_v0 }
 0xb25   :  { %2361 = vmatprep.subr.bf16.mxu0 %v2610_v0 }
 0xb27   :  { %2372 = vmatpush3.bf16.msra.mxu1 %v2668_v10 }
 0xb28   :  { %2363 = vmatpush3.bf16.msra.mxu0 %v2725_v44  ;;  %2373 = vmatprep.subr.bf16.mxu1 %v2610_v0 }
 0xb29   :  { %2364 = vmatprep.subr.bf16.mxu0 %v2610_v0 }
 0xb2c   :  { %2366 = vmatpush3.bf16.msra.mxu0 %v2737_v49 }
 0xb2d   :  { %2385 = vmatprep.subr.bf16.mxu0 %v2610_v0 }
 0xbf2   :  { %v1088_v12 = vpop.f32.mrb[16].mxu0 }
 0xbf3   :  { %v1092_v17 = vadd.f32 %v1088_v12, %v171_v16  ;;  %v2167_v18 = vpop.f32.mrb[17].mxu0 }
 0xbf5   :  { %2487 = vtanh.f32 %v1092_v17  ;;  %v992_v19 = vpop.f32.mrb[6].mxu1  ;;  %v1887_v24 = vmul.f32 -1.442695, %v1092_v17 }
 0xbf6   :  { %v993_v20 = vadd.f32 %v2783_v62, %v992_v19  ;;  %v2156_v21 = vpop.f32.mrb[7].mxu1 }
 0xbf8   :  { %2489 = vtanh.f32 %v993_v20  ;;  %v1885_v25 = vmul.f32 -1.442695, %v993_v20 }
 0xbf9   :  { %2491 = vpow2.f32 %v1887_v24 }
 0xbfa   :  { %2493 = vpow2.f32 %v1885_v25 }
 0xbff   :  { %v2488_v22 = vpop.eup %2487 }
 0xc00   :  { %1102 = vrot.lane.b32.xlu0 %v2488_v22, %s2613_s10 }
 0xc02   :  { %v2490_v23 = vpop.eup %2489 }
 0xc03   :  { %1005 = vrot.lane.b32.xlu1 %v2490_v23, %s2613_s10  ;;  %v2492_v56 = vpop.eup %2491 }
 0xc04   :  { %v1096_v26 = vadd.f32 1.0, %v2492_v56  ;;  %v2494_v27 = vpop.eup %2493 }
 0xc05   :  { %v999_v28 = vadd.f32 1.0, %v2494_v27 }
 0xc06   :  { %2495 = vrcp.f32 %v1096_v26 }
 0xc07   :  { %2497 = vrcp.f32 %v999_v28 }
 0xc10   :  { %v2496_v29 = vpop.eup %2495 }
 0xc11   :  { %v2498_v33 = vpop.eup %2497  ;;  %v1100_v37 = vmul.f32 %v2496_v29, %v2868_v61 }
 0xc12   :  { %v1003_v41 = vmul.f32 %v2498_v33, %v2872_v2 }
 0xc72   :  { %v1103_v31 = vpop.permute.xlu0 %1102 }
 0xc73   :  { %v1105_v32 = vmul.f32 %v2496_v29, %v1103_v31 }
 0xc75   :  { %1107 = vrot.lane.b32.xlu0 %v1105_v32, %s2614_s13  ;;  %v1006_v35 = vpop.permute.xlu1 %1005 }
 0xc76   :  { %v1008_v36 = vmul.f32 %v2498_v33, %v1006_v35 }
 0xc78   :  { %1010 = vrot.lane.b32.xlu1 %v1008_v36, %s2614_s13  ;;  %v181_v36 = vadd.f32 %v2685_v13, %v2763_v58 }
 0xce7   :  { %v1108_v38 = vpop.permute.xlu0 %1107 }
 0xce8   :  { %v2906_v40 = vadd.f32 %v1108_v38, %v1100_v37 }
 0xcea   :  { %2499 = vtanh.f32 %v2906_v40  ;;  %v1011_v42 = vpop.permute.xlu1 %1010 }
 0xceb   :  { %v2910_v53 = vadd.f32 %v1011_v42, %v1003_v41 }
 0xced   :  { %2501 = vtanh.f32 %v2910_v53 }
 0xcf4   :  { %v2500_v43 = vpop.eup %2499 }
 0xcf5   :  { %1113 = vrot.lane.b32.xlu0 %v2500_v43, %s2613_s10 }
 0xcf7   :  { %v2502_v30 = vpop.eup %2501 }
 0xcf8   :  { %1016 = vrot.lane.b32.xlu1 %v2502_v30, %s2613_s10 }
 0xd67   :  { %v1114_v45 = vpop.permute.xlu0 %1113 }
 0xd68   :  { %v1116_v46 = vmul.f32 %v2496_v29, %v1114_v45 }
 0xd6a   :  { %1118 = vrot.lane.b32.xlu1 %v1116_v46, %s2614_s13  ;;  %v1017_v47 = vpop.permute.xlu1 %1016 }
 0xd6b   :  { %v1019_v48 = vmul.f32 %v2498_v33, %v1017_v47 }
 0xd6d   :  { %1122 = vrot.lane.b32.xlu0 %v1019_v48, %s2613_s10 }
 0xddc   :  { %v1119_v50 = vpop.permute.xlu1 %1118 }
 0xddd   :  { %2196 = vmatmul.mubr.msk.f32.vlgmr.msra.gmra.mrb[8].mxu1 %vm193_vm2, %v1119_v50 }
 0xdde   :  { %2375 = vmatpush3.bf16.msra.mxu1 %v2700_v34  ;;  %2214 = vmatprep.mubr.msk.f32.mxu1 %vm2611_vm0, %v2612_v1 }
 0xddf   :  { %2376 = vmatprep.subr.bf16.mxu1 %v2610_v0  ;;  %v1123_v51 = vpop.permute.xlu0 %1122 }
 0xde0   :  { %v1125_v52 = vsel %vm193_vm2, %v1119_v50, %v1123_v51 }
 0xde1   :  { %2185 = vmatmul.mubr.msk.f32.vlgmr.msra.gmra.mrb[18].mxu0 %vm309_vm3, %v1125_v52 }
 0xde2   :  { %2378 = vmatpush3.bf16.msra.mxu1 %v2711_v39  ;;  %2387 = vmatpush3.bf16.msra.mxu0 %v2657_v5 }
 0xde3   :  { %2379 = vmatprep.subr.bf16.mxu1 %v2610_v0  ;;  %2388 = vmatprep.subr.bf16.mxu0 %v2610_v0 }
 0xde4   :  { %2225 = vmatprep.mubr.msk.f32.mxu0 %vm2611_vm0, %v2612_v1 }
 0xde6   :  { %2381 = vmatpush3.bf16.msra.mxu1 %v2725_v44  ;;  %2390 = vmatpush3.bf16.msra.mxu0 %v2668_v10 }
 0xde7   :  { %2382 = vmatprep.subr.bf16.mxu1 %v2610_v0  ;;  %2391 = vmatprep.subr.bf16.mxu0 %v2610_v0 }
 0xdea   :  { %2384 = vmatpush3.bf16.msra.mxu1 %v2737_v49 }
 0xdeb   :  { %2403 = vmatprep.subr.bf16.mxu1 %v2610_v0 }
 0xeb0   :  { %v1291_v60 = vpop.f32.mrb[8].mxu1 }
 0xeb1   :  { %v1295_v61 = vadd.f32 %v1291_v60, %v176_v59  ;;  %v2197_v63 = vpop.f32.mrb[9].mxu1 }
 0xeb3   :  { %2503 = vtanh.f32 %v1295_v61  ;;  %v1891_v7 = vmul.f32 -1.442695, %v1295_v61 }
 0xeb4   :  { %v1195_v54 = vpop.f32.mrb[18].mxu0 }
 0xeb5   :  { %v1196_v2 = vadd.f32 %v2783_v62, %v1195_v54  ;;  %v2186_v3 = vpop.f32.mrb[19].mxu0 }
 0xeb7   :  { %2505 = vtanh.f32 %v1196_v2  ;;  %v1889_v8 = vmul.f32 -1.442695, %v1196_v2 }
 0xeb8   :  { %2507 = vpow2.f32 %v1891_v7 }
 0xeb9   :  { %2509 = vpow2.f32 %v1889_v8 }
 0xebd   :  { %v2504_v4 = vpop.eup %2503 }
 0xebe   :  { %1305 = vrot.lane.b32.xlu0 %v2504_v4, %s2613_s10 }
 0xec1   :  { %v2506_v6 = vpop.eup %2505 }
 0xec2   :  { %1208 = vrot.lane.b32.xlu1 %v2506_v6, %s2613_s10  ;;  %v2508_v55 = vpop.eup %2507 }
 0xec3   :  { %v1299_v9 = vadd.f32 1.0, %v2508_v55  ;;  %v2510_v11 = vpop.eup %2509 }
 0xec4   :  { %v1202_v14 = vadd.f32 1.0, %v2510_v11 }
 0xec5   :  { %2511 = vrcp.f32 %v1299_v9 }
 0xec6   :  { %2513 = vrcp.f32 %v1202_v14 }
 0xecf   :  { %v2512_v15 = vpop.eup %2511 }
 0xed0   :  { %v2514_v17 = vpop.eup %2513  ;;  %v1303_v20 = vmul.f32 %v2512_v15, %v2906_v40 }
 0xed1   :  { %v1206_v23 = vmul.f32 %v2514_v17, %v2910_v53 }
 0xf30   :  { %v1306_v16 = vpop.permute.xlu0 %1305 }
 0xf31   :  { %v1308_v12 = vmul.f32 %v2512_v15, %v1306_v16 }
 0xf33   :  { %1310 = vrot.lane.b32.xlu0 %v1308_v12, %s2614_s13 }
 0xf34   :  { %v1209_v18 = vpop.permute.xlu1 %1208 }
 0xf35   :  { %v1211_v19 = vmul.f32 %v2514_v17, %v1209_v18 }
 0xf37   :  { %1213 = vrot.lane.b32.xlu1 %v1211_v19, %s2614_s13 }
 0xfa5   :  { %v1311_v21 = vpop.permute.xlu0 %1310 }
 0xfa6   :  { %v2944_v22 = vadd.f32 %v1311_v21, %v1303_v20 }
 0xfa8   :  { %2515 = vtanh.f32 %v2944_v22 }
 0xfa9   :  { %v1214_v24 = vpop.permute.xlu1 %1213 }
 0xfaa   :  { %v2948_v25 = vadd.f32 %v1214_v24, %v1206_v23 }
 0xfac   :  { %2517 = vtanh.f32 %v2948_v25 }
 0xfb2   :  { %v2516_v56 = vpop.eup %2515 }
 0xfb3   :  { %1316 = vrot.lane.b32.xlu0 %v2516_v56, %s2613_s10 }
 0xfb6   :  { %v2518_v26 = vpop.eup %2517 }
 0xfb7   :  { %1219 = vrot.lane.b32.xlu1 %v2518_v26, %s2613_s10 }
0x1025   :  { %v1317_v27 = vpop.permute.xlu0 %1316 }
0x1026   :  { %v1319_v28 = vmul.f32 %v2512_v15, %v1317_v27 }
0x1028   :  { %1321 = vrot.lane.b32.xlu1 %v1319_v28, %s2614_s13 }
0x1029   :  { %v1220_v29 = vpop.permute.xlu1 %1219 }
0x102a   :  { %v1222_v31 = vmul.f32 %v2514_v17, %v1220_v29 }
0x102c   :  { %1325 = vrot.lane.b32.xlu0 %v1222_v31, %s2613_s10 }
0x109a   :  { %v1322_v32 = vpop.permute.xlu1 %1321 }
0x109b   :  { %2226 = vmatmul.mubr.msk.f32.vlgmr.msra.gmra.mrb[20].mxu0 %vm193_vm2, %v1322_v32 }
0x109c   :  { %2393 = vmatpush3.bf16.msra.mxu0 %v2700_v34  ;;  %2244 = vmatprep.mubr.msk.f32.mxu0 %vm2611_vm0, %v2612_v1 }
0x109d   :  { %2394 = vmatprep.subr.bf16.mxu0 %v2610_v0 }
0x109e   :  { %v1326_v33 = vpop.permute.xlu0 %1325 }
0x109f   :  { %v1328_v35 = vsel %vm193_vm2, %v1322_v32, %v1326_v33 }
0x10a0   :  { %2396 = vmatpush3.bf16.msra.mxu0 %v2711_v39  ;;  %2215 = vmatmul.mubr.msk.f32.vlgmr.msra.gmra.mrb[10].mxu1 %vm309_vm3, %v1328_v35 }
0x10a1   :  { %2397 = vmatprep.subr.bf16.mxu0 %v2610_v0  ;;  %2405 = vmatpush3.bf16.msra.mxu1 %v2657_v5 }
0x10a2   :  { %2255 = vmatprep.mubr.msk.f32.mxu1 %vm2611_vm0, %v2612_v1  ;;  %2406 = vmatprep.subr.bf16.mxu1 %v2610_v0 }
0x10a4   :  { %2399 = vmatpush3.bf16.msra.mxu0 %v2725_v44 }
0x10a5   :  { %2400 = vmatprep.subr.bf16.mxu0 %v2610_v0  ;;  %2408 = vmatpush3.bf16.msra.mxu1 %v2668_v10 }
0x10a6   :  { %2409 = vmatprep.subr.bf16.mxu1 %v2610_v0 }
0x10a8   :  { %2402 = vmatpush3.bf16.msra.mxu0 %v2737_v49 }
0x116e   :  { %v1494_v37 = vpop.f32.mrb[20].mxu0 }
0x116f   :  { %v1498_v5 = vadd.f32 %v1494_v37, %v181_v36  ;;  %v2227_v38 = vpop.f32.mrb[21].mxu0 }
0x1171   :  { %2519 = vtanh.f32 %v1498_v5  ;;  %v1895_v43 = vmul.f32 -1.442695, %v1498_v5 }
0x1173   :  { %v1398_v40 = vpop.f32.mrb[10].mxu1 }
0x1174   :  { %v1399_v41 = vadd.f32 %v2783_v62, %v1398_v40  ;;  %v2216_v42 = vpop.f32.mrb[11].mxu1 }
0x1176   :  { %2521 = vtanh.f32 %v1399_v41  ;;  %v1893_v30 = vmul.f32 -1.442695, %v1399_v41 }
0x1177   :  { %2523 = vpow2.f32 %v1895_v43 }
0x1178   :  { %2525 = vpow2.f32 %v1893_v30 }
0x117b   :  { %v2520_v53 = vpop.eup %2519 }
0x117c   :  { %1508 = vrot.lane.b32.xlu0 %v2520_v53, %s2613_s10 }
0x1180   :  { %v2522_v10 = vpop.eup %2521 }
0x1181   :  { %1411 = vrot.lane.b32.xlu1 %v2522_v10, %s2613_s10  ;;  %v2524_v58 = vpop.eup %2523 }
0x1182   :  { %v1502_v45 = vadd.f32 1.0, %v2524_v58  ;;  %v2526_v46 = vpop.eup %2525 }
0x1183   :  { %v1405_v47 = vadd.f32 1.0, %v2526_v46 }
0x1184   :  { %2527 = vrcp.f32 %v1502_v45 }
0x1185   :  { %2529 = vrcp.f32 %v1405_v47 }
0x118e   :  { %v2528_v48 = vpop.eup %2527 }
0x118f   :  { %v2530_v52 = vpop.eup %2529  ;;  %v1506_v61 = vmul.f32 %v2528_v48, %v2944_v22 }
0x1190   :  { %v1409_v2 = vmul.f32 %v2530_v52, %v2948_v25 }
0x11ee   :  { %v1509_v50 = vpop.permute.xlu0 %1508 }
0x11ef   :  { %v1511_v51 = vmul.f32 %v2528_v48, %v1509_v50 }
0x11f1   :  { %1513 = vrot.lane.b32.xlu0 %v1511_v51, %s2614_s13 }
0x11f3   :  { %v1412_v59 = vpop.permute.xlu1 %1411 }
0x11f4   :  { %v1414_v60 = vmul.f32 %v2530_v52, %v1412_v59 }
0x11f6   :  { %1416 = vrot.lane.b32.xlu1 %v1414_v60, %s2614_s13 }
0x1263   :  { %v1514_v63 = vpop.permute.xlu0 %1513 }
0x1264   :  { %v1516_v54 = vadd.f32 %v1514_v63, %v1506_v61 }
0x1266   :  { %2531 = vtanh.f32 %v1516_v54 }
0x1268   :  { %v1417_v3 = vpop.permute.xlu1 %1416 }
0x1269   :  { %v1419_v4 = vadd.f32 %v1417_v3, %v1409_v2 }
0x126b   :  { %2533 = vtanh.f32 %v1419_v4 }
0x1270   :  { %v2532_v6 = vpop.eup %2531 }
0x1271   :  { %1519 = vrot.lane.b32.xlu0 %v2532_v6, %s2613_s10 }
0x1275   :  { %v2534_v7 = vpop.eup %2533 }
0x1276   :  { %1422 = vrot.lane.b32.xlu1 %v2534_v7, %s2613_s10 }
0x12e3   :  { %v1520_v8 = vpop.permute.xlu0 %1519 }
0x12e4   :  { %v1522_v55 = vmul.f32 %v2528_v48, %v1520_v8 }
0x12e6   :  { %1524 = vrot.lane.b32.xlu1 %v1522_v55, %s2614_s13 }
0x12e8   :  { %v1423_v9 = vpop.permute.xlu1 %1422 }
0x12e9   :  { %v1425_v11 = vmul.f32 %v2530_v52, %v1423_v9 }
0x12eb   :  { %1528 = vrot.lane.b32.xlu0 %v1425_v11, %s2613_s10 }
0x1358   :  { %v1525_v14 = vpop.permute.xlu1 %1524 }
0x1359   :  { %2256 = vmatmul.mubr.msk.f32.vlgmr.msra.gmra.mrb[12].mxu1 %vm193_vm2, %v1525_v14 }
0x135a   :  { %2411 = vmatpush3.bf16.msra.mxu1 %v2700_v34  ;;  %2274 = vmatprep.mubr.msk.f32.mxu1 %vm2611_vm0, %v2612_v1  ;;  %v186_v1 = vadd.f32 %v2761_v57, %v2685_v13 }
0x135b   :  { %2412 = vmatprep.subr.bf16.mxu1 %v2610_v0 }
0x135d   :  { %v1529_v15 = vpop.permute.xlu0 %1528 }
0x135e   :  { %2414 = vmatpush3.bf16.msra.mxu1 %v2711_v39  ;;  %v1531_v16 = vsel %vm193_vm2, %v1525_v14, %v1529_v15 }
0x135f   :  { %2415 = vmatprep.subr.bf16.mxu1 %v2610_v0  ;;  %2245 = vmatmul.mubr.msk.f32.vlgmr.msra.gmra.mrb[22].mxu0 %vm309_vm3, %v1531_v16 }
0x1362   :  { %2417 = vmatpush3.bf16.msra.mxu1 %v2725_v44 }
0x1363   :  { %2418 = vmatprep.subr.bf16.mxu1 %v2610_v0 }
0x1366   :  { %2420 = vmatpush3.bf16.msra.mxu1 %v2737_v49 }
0x142c   :  { %v1697_v34 = vpop.f32.mrb[12].mxu1 }
0x142d   :  { %v1701_v12 = vadd.f32 %v1697_v34, %v186_v1  ;;  %v2257_v17 = vpop.f32.mrb[13].mxu1 }
0x142f   :  { %2535 = vtanh.f32 %v1701_v12  ;;  %v1899_v0 = vmul.f32 -1.442695, %v1701_v12 }
0x1432   :  { %v1601_v39 = vpop.f32.mrb[22].mxu0 }
0x1433   :  { %v1602_v18 = vadd.f32 %v2783_v62, %v1601_v39  ;;  %v2246_v19 = vpop.f32.mrb[23].mxu0 }
0x1435   :  { %2537 = vtanh.f32 %v1602_v18  ;;  %v1897_v49 = vmul.f32 -1.442695, %v1602_v18 }
0x1436   :  { %2539 = vpow2.f32 %v1899_v0 }
0x1437   :  { %2541 = vpow2.f32 %v1897_v49 }
0x1439   :  { %v2536_v20 = vpop.eup %2535 }
0x143a   :  { %1711 = vrot.lane.b32.xlu0 %v2536_v20, %s2613_s10 }
0x143f   :  { %v2538_v44 = vpop.eup %2537 }
0x1440   :  { %1614 = vrot.lane.b32.xlu1 %v2538_v44, %s2613_s10  ;;  %v2540_v13 = vpop.eup %2539 }
0x1441   :  { %v1705_v57 = vadd.f32 1.0, %v2540_v13  ;;  %v2542_v21 = vpop.eup %2541 }
0x1442   :  { %v1608_v22 = vadd.f32 1.0, %v2542_v21 }
0x1443   :  { %2543 = vrcp.f32 %v1705_v57 }
0x1444   :  { %2545 = vrcp.f32 %v1608_v22 }
0x144d   :  { %v2544_v23 = vpop.eup %2543 }
0x144e   :  { %v2546_v56 = vpop.eup %2545  ;;  %v1709_v28 = vmul.f32 %v2544_v23, %v1516_v54 }
0x144f   :  { %v1612_v32 = vmul.f32 %v2546_v56, %v1419_v4 }
0x14ac   :  { %v1712_v24 = vpop.permute.xlu0 %1711 }
0x14ad   :  { %v1714_v25 = vmul.f32 %v2544_v23, %v1712_v24 }
0x14af   :  { %1716 = vrot.lane.b32.xlu0 %v1714_v25, %s2614_s13 }
0x14b2   :  { %v1615_v26 = vpop.permute.xlu1 %1614 }
0x14b3   :  { %v1617_v27 = vmul.f32 %v2546_v56, %v1615_v26 }
0x14b5   :  { %1619 = vrot.lane.b32.xlu1 %v1617_v27, %s2614_s13 }
0x1521   :  { %v1717_v29 = vpop.permute.xlu0 %1716 }
0x1522   :  { %v1719_v31 = vadd.f32 %v1717_v29, %v1709_v28 }
0x1524   :  { %2547 = vtanh.f32 %v1719_v31 }
0x1527   :  { %v1620_v33 = vpop.permute.xlu1 %1619 }
0x1528   :  { %v1622_v35 = vadd.f32 %v1620_v33, %v1612_v32 }
0x152a   :  { %2549 = vtanh.f32 %v1622_v35 }
0x152e   :  { %v2548_v36 = vpop.eup %2547 }
0x152f   :  { %1722 = vrot.lane.b32.xlu0 %v2548_v36, %s2613_s10 }
0x1534   :  { %v2550_v37 = vpop.eup %2549 }
0x1535   :  { %1625 = vrot.lane.b32.xlu1 %v2550_v37, %s2613_s10 }
0x15a1   :  { %v1723_v5 = vpop.permute.xlu0 %1722 }
0x15a2   :  { %v1725_v38 = vmul.f32 %v2544_v23, %v1723_v5 }
0x15a4   :  { %1727 = vrot.lane.b32.xlu1 %v1725_v38, %s2614_s13 }
0x15a7   :  { %v1626_v40 = vpop.permute.xlu1 %1625 }
0x15a8   :  { %v1628_v41 = vmul.f32 %v2546_v56, %v1626_v40 }
0x15aa   :  { %1731 = vrot.lane.b32.xlu0 %v1628_v41, %s2613_s10 }
0x1616   :  { %v1728_v42 = vpop.permute.xlu1 %1727 }
0x1617   :  { %v1840_v2 = vsel %vm193_vm2, %v1728_v42, %v1719_v31 }
0x161c   :  { %v1732_v53 = vpop.permute.xlu0 %1731 }
0x161d   :  { %v1734_v10 = vsel %vm193_vm2, %v1728_v42, %v1732_v53 }
0x161e   :  { %2275 = vmatmul.mubr.msk.f32.vlgmr.msra.gmra.mrb[14].mxu1 %vm309_vm3, %v1734_v10 }
0x16f1   :  { %v1804_v43 = vpop.f32.mrb[14].mxu1 }
0x16f2   :  { %v1805_v30 = vadd.f32 %v2783_v62, %v1804_v43  ;;  %v2276_v58 = vpop.f32.mrb[15].mxu1 }
0x16f4   :  { %2551 = vtanh.f32 %v1805_v30  ;;  %v1901_v46 = vmul.f32 -1.442695, %v1805_v30 }
0x16f6   :  { %2553 = vpow2.f32 %v1901_v46 }
0x16fe   :  { %v2552_v45 = vpop.eup %2551 }
0x16ff   :  { %1817 = vrot.lane.b32.xlu1 %v2552_v45, %s2613_s10 }
0x1700   :  { %v2554_v47 = vpop.eup %2553 }
0x1701   :  { %v1811_v48 = vadd.f32 1.0, %v2554_v47 }
0x1703   :  { %2555 = vrcp.f32 %v1811_v48 }
0x170d   :  { %v2556_v50 = vpop.eup %2555 }
0x170e   :  { %v1815_v59 = vmul.f32 %v2556_v50, %v1622_v35 }
0x1771   :  { %v1818_v51 = vpop.permute.xlu1 %1817 }
0x1772   :  { %v1820_v52 = vmul.f32 %v2556_v50, %v1818_v51 }
0x1774   :  { %1822 = vrot.lane.b32.xlu0 %v1820_v52, %s2614_s13 }
0x17e6   :  { %v1823_v60 = vpop.permute.xlu0 %1822 }
0x17e7   :  { %v1825_v61 = vadd.f32 %v1823_v60, %v1815_v59 }
0x17e9   :  { %2557 = vtanh.f32 %v1825_v61 }
0x17f3   :  { %v2558_v62 = vpop.eup %2557 }
0x17f4   :  { %1828 = vrot.lane.b32.xlu1 %v2558_v62, %s2613_s10 }
0x17f8   :  { %1837 = vrot.lane.b32.xlu1 %v1825_v61, %s2613_s10 }
0x1866   :  { %v1829_v63 = vpop.permute.xlu1 %1828 }
0x1867   :  { %v1831_v54 = vmul.f32 %v2556_v50, %v1829_v63 }
0x1869   :  { %1833 = vrot.lane.b32.xlu0 %v1831_v54, %s2615_s1 }
0x186a   :  { %v1838_v4 = vpop.permute.xlu1 %1837 }
0x18db   :  { %v1834_v3 = vpop.permute.xlu0 %1833 }
0x18dc   :  { %v1841_v6 = vsel %vm309_vm3, %v1840_v2, %v1834_v3 }
0x18dd   :  { %v1843_v7 = vsel %vm1842_vm4, %v1841_v6, %v1838_v4 }
0x18de   :  { %1844 = vst [vmem:[#allocation5] sm:$0xff] %v1843_v7 }
0x18df   :  { %2592 = shalt.err (!%p2589_p12)
}
0x18e0   :  { %s2593_s8 = scalar_lea.hbm %s3034_s4, 128 }
0x18e1   :  { %p2594_p13 = scmp.ne.s32.totalorder %s3034_s4, %s2593_s8  ;;  %p2597_p0 = scmp.lt.u32.totalorder %s2593_s8, %s3034_s4 }
0x18e3   :  { %p2599_p1 = pnand %p2597_p0, %p2594_p13 }
0x18e5   :  { %2602 = shalt.err (!%p2599_p1)
}
0x18e6   :  { %1854 = dma.vmem_to_hbm [thread:$0]  %s1852_s2, 128, %s3034_s4, [#allocation4]  }
0x18e7   :  { %2605 = dma.done.wait [#allocation4], 128  }
0x18e8   :  { %2606 = vsyncadd [#allocation4], 4294967168 }
0x18e9   :  { %1858 = vsyncpa [#allocation3], 1 }
0x18ea   :  { %1859 = vsyncpa [#allocation4], 1 }

</bundles_post_ra>
